<compile_context>
chip_gen: v7x
topology: tpu7x:2x2x1
jax: 0.10.0
libtpu: 0.0.40
codegen_flags: <defaults>
</compile_context>

<pallas_src>
import functools

import jax
import jax.numpy as jnp
from jax.experimental import pallas as pl
from jax.experimental.pallas import tpu as pltpu


_LANES = 128
# Minimum sublane multiple per element byte-width (packed vreg rows).
_SUBLANE_MULT = {4: 8, 2: 16, 1: 32}
# Below this many bytes per tensor, XLA's fused elementwise beats a custom call.
_MIN_PALLAS_BYTES = 1 << 20          # 1 MiB
# Target per-pipeline-buffer block size: 2 inputs + 1 output, double-buffered
# => ~6 MiB of VMEM, comfortably inside v5e/v6e/v7x scoped-VMEM budgets.
_TARGET_BLOCK_BYTES = 1 << 20        # 1 MiB


def _blend_kernel(x_last_ref, x_mid_ref, o_ref, *, alpha):
    # out = x_last + alpha * (x_mid - x_last)   (pure VPU, math in f32)
    a = jnp.float32(alpha)
    xl = x_last_ref[...].astype(jnp.float32)
    xm = x_mid_ref[...].astype(jnp.float32)
    o_ref[...] = (xl + a * (xm - xl)).astype(o_ref.dtype)


def _blend_jnp(x_last, x_mid, alpha):
    # Fallback for tiny / layout-awkward inputs: let XLA fuse it.
    a = jnp.float32(alpha)
    xl = x_last.astype(jnp.float32)
    xm = x_mid.astype(jnp.float32)
    return (xl + a * (xm - xl)).astype(x_last.dtype)


def _blend_pallas(x_last: jax.Array, x_mid: jax.Array, alpha: float) -> jax.Array:
    assert x_last.shape == x_mid.shape and x_last.dtype == x_mid.dtype
    orig_shape = x_last.shape
    dtype = x_last.dtype
    total = x_last.size
    itemsize = dtype.itemsize
    sub = _SUBLANE_MULT.get(itemsize, 8)

    # Tiny or non-tileable totals: a custom call plus pad/slice HBM round trips
    # would cost more than the blend itself.
    if total * itemsize < _MIN_PALLAS_BYTES or total % (sub * _LANES) != 0:
        return _blend_jnp(x_last, x_mid, alpha)

    # Lane-dense slab (rows, W): widest W (multiple of 128) with an exact
    # reshape and rows a multiple of the sublane packing (unmasked accesses).
    W = _LANES
    for cand in (4096, 2048, 1024, 512, 256):
        if total % cand == 0 and (total // cand) % sub == 0:
            W = cand
            break
    rows = total // W

    # ~1 MiB per buffer; tile rows rounded to the dtype's sublane multiple.
    tile_rows = max(sub, (_TARGET_BLOCK_BYTES // (itemsize * W)) // sub * sub)
    tile_rows = min(tile_rows, rows)
    grid_rows = pl.cdiv(rows, tile_rows)  # edge block (if any) is masked by Pallas

    a2d = x_last.reshape(rows, W)
    b2d = x_mid.reshape(rows, W)

    out2d = pl.pallas_call(
        functools.partial(_blend_kernel, alpha=float(alpha)),
        out_shape=jax.ShapeDtypeStruct((rows, W), dtype),
        grid=(grid_rows,),
        in_specs=[
            pl.BlockSpec((tile_rows, W), lambda i: (i, 0)),
            pl.BlockSpec((tile_rows, W), lambda i: (i, 0)),
        ],
        out_specs=pl.BlockSpec((tile_rows, W), lambda i: (i, 0)),
        compiler_params=pltpu.CompilerParams(
            dimension_semantics=("parallel",),     # lets v7x shard across 2 TCs
            vmem_limit_bytes=32 * 1024 * 1024,     # headroom on v5e's 16 MiB default
        ),
    )(a2d, b2d)

    return out2d.reshape(orig_shape)


class InitialConnection:
    """JAX/Pallas port of the PyTorch InitialConnection module."""

    def __init__(self, alpha: float = 0.5):
        self.alpha = alpha

    def __call__(self, Xs: list):
        assert len(Xs) >= 1
        Xs = list(Xs)
        if len(Xs) <= 2:
            Xs[-1] = Xs[-1]
        else:
            Xs[-1] = _blend_pallas(Xs[-1], Xs[1], self.alpha)
        return (Xs[-1], Xs)


if __name__ == "__main__":
    key = jax.random.PRNGKey(0)
    k0, k1, k2, k3, k4, k5 = jax.random.split(key, 6)
    module = InitialConnection(alpha=0.5)

    # --- Tiny NCHW maps (natural module size): fused-XLA fast path ---------
    shape_small = (2, 4, 16, 16)
    x0 = jax.random.normal(k0, shape_small, dtype=jnp.float32)
    x1 = jax.random.normal(k1, shape_small, dtype=jnp.float32)
    x2 = jax.random.normal(k2, shape_small, dtype=jnp.float32)

    out, xs_new = module([x0, x1, x2])
    out = jax.block_until_ready(out)
    ref = 0.5 * x2 + 0.5 * x1
    assert jnp.allclose(out, ref, atol=1e-5), "mismatch (small, len>2)"
    assert jnp.allclose(xs_new[-1], ref, atol=1e-5)

    # len(Xs) <= 2: pass-through
    out2, _ = module([x0, x1])
    out2 = jax.block_until_ready(out2)
    assert jnp.allclose(out2, x1), "mismatch (len<=2)"

    # --- Larger f32 maps: exercises the Pallas kernel path ------------------
    shape_big = (2, 16, 128, 128)   # 2 MiB / tensor -> Pallas path
    y0 = jax.random.normal(k3, shape_big, dtype=jnp.float32)
    y1 = jax.random.normal(k4, shape_big, dtype=jnp.float32)
    y2 = jax.random.normal(k5, shape_big, dtype=jnp.float32)
    out3, _ = module([y0, y1, y2])
    out3 = jax.block_until_ready(out3)
    ref3 = 0.5 * y2 + 0.5 * y1
    assert jnp.allclose(out3, ref3, atol=1e-5), "mismatch (large f32)"

    # --- bf16 inputs through the kernel (f32 math, one cast on store) -------
    z0, z1, z2 = (t.astype(jnp.bfloat16) for t in (y0, y1, y2))
    out4, _ = module([z0, z1, z2])
    out4 = jax.block_until_ready(out4)
    ref4 = (z2.astype(jnp.float32)
            + 0.5 * (z1.astype(jnp.float32) - z2.astype(jnp.float32))
            ).astype(jnp.bfloat16)
    assert jnp.allclose(out4.astype(jnp.float32), ref4.astype(jnp.float32),
                        atol=3e-2), "mismatch (large bf16)"

    print("KERNEL_OK")
</pallas_src>

<mosaic_0001>
module attributes {stable_mosaic.version = 11 : i64} {
  func.func @_blend_kernel(%arg0: i32, %arg1: memref<64x4096xf32, #tpu.memory_space<vmem>>, %arg2: memref<64x4096xf32, #tpu.memory_space<vmem>>, %arg3: memref<64x4096xf32, #tpu.memory_space<vmem>>) attributes {dimension_semantics = [#tpu.dimension_semantics<parallel>], iteration_bounds = array<i64: 2>, scalar_prefetch = 0 : i64, scratch_operands = 0 : i64, tpu.core_type = #tpu.core_type<tc>, window_params = [{transform_indices = @transform_0, window_bounds = array<i64: 64, 4096>}, {transform_indices = @transform_1, window_bounds = array<i64: 64, 4096>}, {transform_indices = @transform_2, window_bounds = array<i64: 64, 4096>}]} {
    %c0 = arith.constant 0 : index
    %c0_0 = arith.constant 0 : index
    %0 = vector.load %arg1[%c0, %c0_0] : memref<64x4096xf32, #tpu.memory_space<vmem>>, vector<64x4096xf32>
    %c0_1 = arith.constant 0 : index
    %c0_2 = arith.constant 0 : index
    %1 = vector.load %arg2[%c0_1, %c0_2] : memref<64x4096xf32, #tpu.memory_space<vmem>>, vector<64x4096xf32>
    %2 = arith.subf %1, %0 : vector<64x4096xf32>
    %cst = arith.constant 5.000000e-01 : f32
    %3 = vector.broadcast %cst : f32 to vector<64x4096xf32>
    %4 = arith.mulf %3, %2 : vector<64x4096xf32>
    %5 = arith.addf %0, %4 : vector<64x4096xf32>
    %c0_3 = arith.constant 0 : index
    %c0_4 = arith.constant 0 : index
    %6 = vector.load %arg3[%c0_3, %c0_4] : memref<64x4096xf32, #tpu.memory_space<vmem>>, vector<64x4096xf32>
    tpu.vector_store %arg3[%c0_3, %c0_4], %5 {strides = array<i32>} : memref<64x4096xf32, #tpu.memory_space<vmem>>, vector<64x4096xf32>,
    return
  }
  func.func @transform_0(%arg0: i32) -> (i32, i32) {
    %c0_i32 = arith.constant 0 : i32
    %c0_i32_0 = arith.constant 0 : i32
    return %arg0, %c0_i32 : i32, i32
  }
  func.func @transform_1(%arg0: i32) -> (i32, i32) {
    %c0_i32 = arith.constant 0 : i32
    %c0_i32_0 = arith.constant 0 : i32
    return %arg0, %c0_i32 : i32, i32
  }
  func.func @transform_2(%arg0: i32) -> (i32, i32) {
    %c0_i32 = arith.constant 0 : i32
    %c0_i32_0 = arith.constant 0 : i32
    return %arg0, %c0_i32 : i32, i32
  }
}

</mosaic_0001>

<bundles_post_ra>
// kernel: tpu_custom_call.1
= control target key start
LH: loop header
LB: loop body
LE: loop exit
PB: predicated region body
PF: predicated region fallthrough
CT: control target
= control target key end

     0   :  { %7 = vsyncpa [#allocation3], 0  ;;  %s3093_s0 = inlined_call_operand.hbm [shape: f32[128,4096], index: 0, kind: input, shape index: {}]   ;;  %s3094_s1 = inlined_call_operand.hbm [shape: f32[128,4096], index: 1, kind: input, shape index: {}]   ;;  %s3095_s2 = inlined_call_operand.hbm [shape: f32[128,4096], index: 2, kind: output, shape index: {}]  }
   0x1   :  { %9 = vsyncpa [#allocation3 + $0x1], 0 }
   0x2   :  { %10 = vsyncpa [#allocation6], 0 }
   0x3   :  { %12 = vsyncpa [#allocation6 + $0x1], 0 }
   0x4   :  { %13 = vsyncpa [#allocation4], 0 }
   0x5   :  { %15 = vsyncpa [#allocation4 + $0x1], 0  ;;  %s2090_s9 = smov 0   ;;  %s2092_s10 = smov 0  }
   0x6   :  { %s2094_s11 = smov 0   ;;  %s2096_s12 = smov 0  }
   0x7 LB: > { %s2111_s13 = sadd.s32 4294967295, %s2066_s12   ;;  %s1854_s14 = sadd.s32 4294967294, %s2066_s12   ;;  %s2066_s12 = sphi %s2096_s12, %s3111_s12   ;;  %s2062_s11 = sphi %s2094_s11, %s3110_s11   ;;  %s2058_s10 = sphi %s2092_s10, %s3109_s10   ;;  %s2054_s9 = sphi %s2090_s9, %s3108_s9  }
   0x8   : > { %s2115_s15 = sadd.s32 1, %s2066_s12   ;;  %s28_s16 = sadd.s32 1, %s2062_s11 }
   0x9   : > { %s25_s17 = ssub.s32 %s2066_s12, %s2115_s15  ;;  %p35_p0 = scmp.ne.s32.totalorder %s2062_s11, %s2058_s10 }
   0xa   : > { %p26_p1 = scmp.eq.s32.totalorder %s25_s17, 0  ;;  %p36_p2 = scmp.eq.s32.totalorder %s2066_s12, 0 }
   0xb   : > { %p41_p3 = scmp.ne.s32.totalorder %s2058_s10, %s2054_s9  ;;  %p42_p4 = scmp.eq.s32.totalorder %s2111_s13, 0 }
   0xc   : > { %s2127_s18 = scalar_select %p26_p1, %s2062_s11, %s28_s16  }
   0xd   : > { %p2129_p5 = por %p36_p2, %p35_p0  ;;  %p2133_p6 = por %p42_p4, %p41_p3 }
   0xe   : > { %p91_p7 = scmp.eq.s32.totalorder %s2111_s13, 1  ;;  %p97_p8 = scmp.eq.s32.totalorder %s1854_s14, 1 }
   0xf   : > { %s3099_s20 = scalar_select %p2133_p6, 1, 0 }
  0x10   : > { %p1898_p10 = scmp.lt.s32.totalorder %s2066_s12, 2  ;;  %p2140_p11 = por %p91_p7, %p35_p0 }
  0x11   : > { %p2144_p12 = por %p97_p8, %p41_p3  ;;  %s2149_s23 = sand.u32 1, %s2062_s11  }
  0x12   : > { %s3100_s21 = scalar_select %p2140_p11, 1, 0 }
  0x13   : > { %s3101_s22 = scalar_select %p2144_p12, 1, 0 }
  0x14   : > { %s1876_s24 = sshll.u32 %s2066_s12, 15  ;;  %s1857_s25 = sshll.u32 %s2149_s23, 11 }
  0x15   : > { %s2158_s28 = scalar_lea.hbm %s3093_s0, %s1876_s24  ;;  %s121_s29 = scalar_lea.vmem [#allocation2], %s1857_s25 }
  0x16   : > { %s129_s30 = sshll.u32 %s121_s29, 4  ;;  %p2164_p13 = pnand %p1898_p10, %p2129_p5  ;;  %s2168_s30 = int_to_ptr.vmem [resolvable:$true] %s129_s30 }
  0x17   : > { %s118_s4 = scalar_lea.sflag [#allocation3], %s2149_s23  ;;  %s1936_s5 = scalar_lea.hbm %s2158_s28, 32768 }
  0x18   : > { %p1937_p0 = scmp.ne.s32.totalorder %s2158_s28, %s1936_s5  ;;  %p1938_p1 = pneg %p2164_p13 }
  0x19   : > { %s1941_s8 = scalar_lea.hbm %s3093_s0, 65536  ;;  %p1942_p4 = scmp.lt.u32.totalorder %s2158_s28, %s3093_s0 }
  0x1a   : > { %p1939_p2 = pnand %p1938_p1, %p1937_p0  ;;  %p1943_p5 = scmp.lt.u32.totalorder %s1941_s8, %s1936_s5 }
  0x1b   : > { %p1945_p8 = scmp.lt.u32.totalorder %s1936_s5, %s2158_s28 }
  0x1c   : > { %p1940_p3 = pneg %p1939_p2  ;;  %p1944_p7 = por %p1943_p5, %p1942_p4 }
  0x1e   : > { %p1946_p10 = por %p1945_p8, %p1944_p7 }
  0x20   : > { %p1947_p9 = pnand %p1946_p10, %p1940_p3 }
  0x22   : > { %1950 = shalt.err (!%p1947_p9)
}
  0x23   : > { %s1951_s17 = scalar_lea.vmem %s2168_s30, 32768  ;;  %s2068_s19 = smov [#allocation2]  }
  0x24   : > { %p1952_p0 = scmp.ne.s32.totalorder %s2168_s30, %s1951_s17  ;;  %s1956_s26 = sshll.u32 %s2068_s19, 4  ;;  %s1957_s26 = int_to_ptr.vmem [resolvable:$false] %s1956_s26 }
  0x25   : > { %s1958_s27 = scalar_lea.vmem %s1957_s26, 65536  ;;  %p1959_p11 = scmp.lt.s32.totalorder %s2168_s30, %s1957_s26 }
  0x26   : > { %p1954_p2 = pnand %p1952_p0, %p1938_p1  ;;  %p1960_p4 = scmp.lt.s32.totalorder %s1958_s27, %s1951_s17 }
  0x28   : > { %p1955_p12 = pneg %p1954_p2  ;;  %p1961_p5 = por %p1960_p4, %p1959_p11 }
  0x2a   : > { %p1962_p7 = pnand %p1961_p5, %p1955_p12 }
  0x2c   : > { %1965 = shalt.err (!%p1962_p7)
}
  0x2d   : > { %s2069_s29 = smov 4096   ;;  %s2070_s5 = smov 256  }
  0x2e   : > { %1890 = dma.hbm_to_vmem [thread:$0]  (!%p2164_p13), %s2158_s28, 32768, %s2168_s30, %s118_s4, %s2069_s29, %s2069_s29, %s2070_s5  }
  0x2f   : > { %p1865_p9 = scmp.ge.s32.totalorder %s2066_s12, 1  ;;  %p159_p11 = scmp.lt.s32.totalorder %s2066_s12, 3 }
  0x30   : > { %s2212_s14 = scalar_lea.hbm %s3094_s1, %s1876_s24  ;;  %s143_s16 = scalar_lea.vmem [#allocation5], %s1857_s25 }
  0x31   : > { %p2203_p12 = pnand %p1865_p9, %p159_p11  ;;  %s151_s17 = sshll.u32 %s143_s16, 4  ;;  %s2216_s17 = int_to_ptr.vmem [resolvable:$true] %s151_s17 }
  0x32   : > { %s140_s28 = scalar_lea.sflag [#allocation6], %s2149_s23  ;;  %s1966_s30 = scalar_lea.hbm %s2212_s14, 32768 }
  0x33   : > { %p1967_p3 = scmp.ne.s32.totalorder %s2212_s14, %s1966_s30  ;;  %s1971_s24 = scalar_lea.hbm %s3094_s1, 65536 }
  0x34   : > { %p1972_p0 = scmp.lt.u32.totalorder %s2212_s14, %s3094_s1  ;;  %p1973_p2 = scmp.lt.u32.totalorder %s1971_s24, %s1966_s30 }
  0x35   : > { %p1969_p8 = pnand %p1967_p3, %p1938_p1  ;;  %p1975_p5 = scmp.lt.u32.totalorder %s1966_s30, %s2212_s14 }
  0x36   : > { %p1974_p4 = por %p1973_p2, %p1972_p0 }
  0x37   : > { %p1970_p10 = pneg %p1969_p8 }
  0x38   : > { %p1976_p7 = por %p1975_p5, %p1974_p4 }
  0x3a   : > { %p1977_p9 = pnand %p1976_p7, %p1970_p10 }
  0x3c   : > { %1980 = shalt.err (!%p1977_p9)
}
  0x3d   : > { %s1981_s25 = scalar_lea.vmem %s2216_s17, 32768  ;;  %s2071_s7 = smov [#allocation5]  }
  0x3e   : > { %p1982_p11 = scmp.ne.s32.totalorder %s2216_s17, %s1981_s25  ;;  %s1986_s8 = sshll.u32 %s2071_s7, 4  ;;  %s1987_s8 = int_to_ptr.vmem [resolvable:$false] %s1986_s8 }
  0x3f   : > { %s1988_s16 = scalar_lea.vmem %s1987_s8, 65536  ;;  %p1989_p6 = scmp.lt.s32.totalorder %s2216_s17, %s1987_s8 }
  0x40   : > { %p1984_p3 = pnand %p1982_p11, %p1938_p1  ;;  %p1990_p0 = scmp.lt.s32.totalorder %s1988_s16, %s1981_s25 }
  0x42   : > { %p1985_p8 = pneg %p1984_p3  ;;  %p1991_p2 = por %p1990_p0, %p1989_p6 }
  0x44   : > { %p1992_p4 = pnand %p1991_p2, %p1985_p8 }
  0x46   : > { %1995 = shalt.err (!%p1992_p4)
}
  0x47   : > { %1893 = dma.hbm_to_vmem [thread:$0]  (!%p2164_p13), %s2212_s14, 32768, %s2216_s17, %s140_s28, %s2069_s29, %s2069_s29, %s2070_s5  }
  0x48   : > { %163 = sbr.rel (%p2203_p12) target bundleno = 296 (0x128), region = 28  ;;  %s2250_s30 = sand.u32 (!%p2203_p12), 1, %s2058_s10  }
  0x49   : > { %s2253_s4 = sshll.u32 (!%p2203_p12), %s2250_s30, 11  ;;  %s166_s3 = scalar_lea.sflag (!%p2203_p12), [#allocation3], %s2250_s30 }
  0x4a   : > { %s2257_s19 = scalar_lea.vmem (!%p2203_p12), [#allocation2], %s2253_s4  ;;  %p3104_p6 = scmp.ne.s32.totalorder (!%p2203_p12), %s3099_s20, 0 }
  0x4f   : > { %2041 = dma.done.wait (%p3104_p6), %s166_s3, 32768  }
  0x50   : > { %2043 = vsyncadd (%p3104_p6), %s166_s3, 4294934528  ;;  %s175_s23 = scalar_lea.sflag [#allocation6], %s2250_s30  ;;  %s2265_s29 = scalar_lea.vmem [#allocation5], %s2253_s4 }
  0x51   : > { %2045 = dma.done.wait (%p3104_p6), %s175_s23, 32768  }
  0x52   : > { %2047 = vsyncadd (%p3104_p6), %s175_s23, 4294934528  ;;  %v207_v0 = vld [vmem:[%s2257_s19] sm:$0xff]  ;;  %v208_v2 = vld [vmem:[%s2257_s19 + $0x8] sm:$0xff]  ;;  %s2293_s20 = scalar_lea.vmem [#allocation7], %s2253_s4  ;;  %s1880_s5 = sshll.u32 %s2111_s13, 15 }
  0x53   : > { %v463_v1 = vld [vmem:[%s2265_s29] sm:$0xff]  ;;  %v464_v4 = vld [vmem:[%s2265_s29 + $0x8] sm:$0xff]  ;;  %v209_v5 = vld [vmem:[%s2257_s19 + $0x10] sm:$0xff]  ;;  %s1758_s6 = sshll.u32 %s2293_s20, 4  ;;  %s3045_s28 = scalar_lea.hbm %s3095_s2, %s1880_s5  ;;  %s3047_s6 = int_to_ptr.vmem [resolvable:$true] %s1758_s6 }
  0x54   : > { %v719_v3 = vsub.f32 %v463_v1, %v207_v0  ;;  %v465_v6 = vld [vmem:[%s2265_s29 + $0x10] sm:$0xff]  ;;  %v720_v7 = vsub.f32 %v464_v4, %v208_v2  ;;  %v210_v9 = vld [vmem:[%s2257_s19 + $0x18] sm:$0xff]  ;;  %v211_v11 = vld [vmem:[%s2257_s19 + $0x20] sm:$0xff]  ;;  %s1744_s13 = scalar_lea.sflag [#allocation4], %s2250_s30  ;;  %s1996_s24 = scalar_lea.vmem %s3047_s6, 32768 }
  0x55   : > { %v721_v8 = vsub.f32 %v465_v6, %v209_v5  ;;  %v466_v10 = vld [vmem:[%s2265_s29 + $0x18] sm:$0xff]  ;;  %v467_v14 = vld [vmem:[%s2265_s29 + $0x20] sm:$0xff]  ;;  %v212_v15 = vld [vmem:[%s2257_s19 + $0x28] sm:$0xff]  ;;  %p1997_p13 = scmp.ne.s32.totalorder %s3047_s6, %s1996_s24  ;;  %p3105_p1 = scmp.ne.s32.totalorder %s3100_s21, 0 }
  0x56   : > { %v975_v12 = vmul.f32 0.5, %v719_v3  ;;  %v722_v13 = vsub.f32 %v466_v10, %v210_v9  ;;  %v468_v16 = vld [vmem:[%s2265_s29 + $0x28] sm:$0xff]  ;;  %v976_v17 = vmul.f32 0.5, %v720_v7  ;;  %v723_v19 = vsub.f32 %v467_v14, %v211_v11  ;;  %v213_v21 = vld [vmem:[%s2257_s19 + $0x30] sm:$0xff]  ;;  %v214_v23 = vld [vmem:[%s2257_s19 + $0x38] sm:$0xff]  ;;  %s2072_s26 = smov [#allocation7]  }
  0x57   : > { %v977_v18 = vmul.f32 0.5, %v721_v8  ;;  %v724_v20 = vsub.f32 %v468_v16, %v212_v15  ;;  %v469_v22 = vld [vmem:[%s2265_s29 + $0x30] sm:$0xff]  ;;  %v470_v27 = vld [vmem:[%s2265_s29 + $0x38] sm:$0xff]  ;;  %v215_v28 = vld [vmem:[%s2257_s19 + $0x40] sm:$0xff]  ;;  %p1998_p12 = pnand %p1997_p13, %p3105_p1  ;;  %s2000_s27 = sshll.u32 %s2072_s26, 4  ;;  %s2001_s27 = int_to_ptr.vmem [resolvable:$false] %s2000_s27 }
  0x58   : > { %v1231_v24 = vadd.f32 %v975_v12, %v207_v0  ;;  %v978_v25 = vmul.f32 0.5, %v722_v13  ;;  %v725_v26 = vsub.f32 %v469_v22, %v213_v21  ;;  %v471_v29 = vld [vmem:[%s2265_s29 + $0x40] sm:$0xff]  ;;  %v1232_v30 = vadd.f32 %v976_v17, %v208_v2  ;;  %v216_v34 = vld [vmem:[%s2257_s19 + $0x48] sm:$0xff]  ;;  %v217_v36 = vld [vmem:[%s2257_s19 + $0x50] sm:$0xff]  ;;  %s2002_s25 = scalar_lea.vmem %s2001_s27, 65536  ;;  %p2003_p5 = scmp.lt.s32.totalorder %s3047_s6, %s2001_s27 }
  0x59   : > { %v1233_v31 = vadd.f32 %v977_v18, %v209_v5  ;;  %v979_v32 = vmul.f32 0.5, %v723_v19  ;;  %v980_v33 = vmul.f32 0.5, %v724_v20  ;;  %v472_v35 = vld [vmem:[%s2265_s29 + $0x48] sm:$0xff]  ;;  %v726_v39 = vsub.f32 %v470_v27, %v214_v23  ;;  %v473_v41 = vld [vmem:[%s2265_s29 + $0x50] sm:$0xff]  ;;  %v218_v42 = vld [vmem:[%s2257_s19 + $0x58] sm:$0xff]  ;;  %p1999_p10 = pneg %p1998_p12  ;;  %p2004_p7 = scmp.lt.s32.totalorder %s2002_s25, %s1996_s24 }
  0x5a   : > { %1487 = vst [vmem:[%s2293_s20] sm:$0xff] %v1231_v24  ;;  %v1234_v37 = vadd.f32 %v978_v25, %v210_v9  ;;  %v981_v38 = vmul.f32 0.5, %v725_v26  ;;  %v727_v40 = vsub.f32 %v471_v29, %v215_v28  ;;  %v474_v43 = vld [vmem:[%s2265_s29 + $0x58] sm:$0xff]  ;;  %1488 = vst [vmem:[%s2293_s20 + $0x8] sm:$0xff] %v1232_v30  ;;  %v728_v46 = vsub.f32 %v472_v35, %v216_v34  ;;  %v219_v48 = vld [vmem:[%s2257_s19 + $0x60] sm:$0xff] }
  0x5b   : > { %1489 = vst [vmem:[%s2293_s20 + $0x10] sm:$0xff] %v1233_v31  ;;  %v1235_v44 = vadd.f32 %v979_v32, %v211_v11  ;;  %v1236_v45 = vadd.f32 %v980_v33, %v212_v15  ;;  %v729_v47 = vsub.f32 %v473_v41, %v217_v36  ;;  %v475_v49 = vld [vmem:[%s2265_s29 + $0x60] sm:$0xff]  ;;  %v220_v50 = vld [vmem:[%s2257_s19 + $0x68] sm:$0xff]  ;;  %v982_v52 = vmul.f32 0.5, %v726_v39  ;;  %v221_v56 = vld [vmem:[%s2257_s19 + $0x70] sm:$0xff]  ;;  %p2005_p9 = por %p2004_p7, %p2003_p5 }
  0x5c   : > { %1490 = vst [vmem:[%s2293_s20 + $0x18] sm:$0xff] %v1234_v37  ;;  %v1237_v51 = vadd.f32 %v981_v38, %v213_v21  ;;  %v983_v53 = vmul.f32 0.5, %v727_v40  ;;  %v730_v54 = vsub.f32 %v474_v43, %v218_v42  ;;  %v476_v55 = vld [vmem:[%s2265_s29 + $0x68] sm:$0xff]  ;;  %v477_v57 = vld [vmem:[%s2265_s29 + $0x70] sm:$0xff]  ;;  %v984_v58 = vmul.f32 0.5, %v728_v46  ;;  %v222_v62 = vld [vmem:[%s2257_s19 + $0x78] sm:$0xff] }
  0x5d   : > { %1491 = vst [vmem:[%s2293_s20 + $0x20] sm:$0xff] %v1235_v44  ;;  %1492 = vst [vmem:[%s2293_s20 + $0x28] sm:$0xff] %v1236_v45  ;;  %v985_v59 = vmul.f32 0.5, %v729_v47  ;;  %v731_v60 = vsub.f32 %v475_v49, %v219_v48  ;;  %v732_v61 = vsub.f32 %v476_v55, %v220_v50  ;;  %v478_v63 = vld [vmem:[%s2265_s29 + $0x78] sm:$0xff]  ;;  %v223_v0 = vld [vmem:[%s2257_s19 + $0x80] sm:$0xff]  ;;  %v1238_v1 = vadd.f32 %v982_v52, %v214_v23  ;;  %p2006_p11 = pnand %p2005_p9, %p1999_p10 }
  0x5e   : > { %1493 = vst [vmem:[%s2293_s20 + $0x30] sm:$0xff] %v1237_v51  ;;  %v1239_v2 = vadd.f32 %v983_v53, %v215_v28  ;;  %v986_v3 = vmul.f32 0.5, %v730_v54  ;;  %v733_v4 = vsub.f32 %v477_v57, %v221_v56  ;;  %v479_v5 = vld [vmem:[%s2265_s29 + $0x80] sm:$0xff]  ;;  %v224_v6 = vld [vmem:[%s2257_s19 + $0x88] sm:$0xff]  ;;  %v1240_v8 = vadd.f32 %v984_v58, %v216_v34  ;;  %v225_v12 = vld [vmem:[%s2257_s19 + $0x90] sm:$0xff] }
  0x5f   : > { %v480_v7 = vld [vmem:[%s2265_s29 + $0x88] sm:$0xff]  ;;  %v1241_v9 = vadd.f32 %v985_v59, %v217_v36  ;;  %v987_v10 = vmul.f32 0.5, %v731_v60  ;;  %v988_v11 = vmul.f32 0.5, %v732_v61  ;;  %v481_v13 = vld [vmem:[%s2265_s29 + $0x90] sm:$0xff]  ;;  %v226_v14 = vld [vmem:[%s2257_s19 + $0x98] sm:$0xff]  ;;  %1494 = vst [vmem:[%s2293_s20 + $0x38] sm:$0xff] %v1238_v1  ;;  %v734_v17 = vsub.f32 %v478_v63, %v222_v62 }
  0x60   : > { %1495 = vst [vmem:[%s2293_s20 + $0x40] sm:$0xff] %v1239_v2  ;;  %v1242_v15 = vadd.f32 %v986_v3, %v218_v42  ;;  %v989_v16 = vmul.f32 0.5, %v733_v4  ;;  %v735_v18 = vsub.f32 %v479_v5, %v223_v0  ;;  %v482_v19 = vld [vmem:[%s2265_s29 + $0x98] sm:$0xff]  ;;  %v227_v20 = vld [vmem:[%s2257_s19 + $0xa0] sm:$0xff]  ;;  %1496 = vst [vmem:[%s2293_s20 + $0x48] sm:$0xff] %v1240_v8  ;;  %v736_v24 = vsub.f32 %v480_v7, %v224_v6 }
  0x61   : > { %v483_v21 = vld [vmem:[%s2265_s29 + $0xa0] sm:$0xff]  ;;  %1497 = vst [vmem:[%s2293_s20 + $0x50] sm:$0xff] %v1241_v9  ;;  %v1243_v22 = vadd.f32 %v987_v10, %v219_v48  ;;  %v1244_v23 = vadd.f32 %v988_v11, %v220_v50  ;;  %v737_v25 = vsub.f32 %v481_v13, %v225_v12  ;;  %v228_v26 = vld [vmem:[%s2257_s19 + $0xa8] sm:$0xff]  ;;  %v229_v28 = vld [vmem:[%s2257_s19 + $0xb0] sm:$0xff]  ;;  %v990_v30 = vmul.f32 0.5, %v734_v17 }
  0x62   : > { %v484_v27 = vld [vmem:[%s2265_s29 + $0xa8] sm:$0xff]  ;;  %1498 = vst [vmem:[%s2293_s20 + $0x58] sm:$0xff] %v1242_v15  ;;  %v1245_v29 = vadd.f32 %v989_v16, %v221_v56  ;;  %v991_v31 = vmul.f32 0.5, %v735_v18  ;;  %v738_v32 = vsub.f32 %v482_v19, %v226_v14  ;;  %v485_v33 = vld [vmem:[%s2265_s29 + $0xb0] sm:$0xff]  ;;  %v230_v34 = vld [vmem:[%s2257_s19 + $0xb8] sm:$0xff]  ;;  %v992_v36 = vmul.f32 0.5, %v736_v24 }
  0x63   : > { %v486_v35 = vld [vmem:[%s2265_s29 + $0xb8] sm:$0xff]  ;;  %1499 = vst [vmem:[%s2293_s20 + $0x60] sm:$0xff] %v1243_v22  ;;  %1500 = vst [vmem:[%s2293_s20 + $0x68] sm:$0xff] %v1244_v23  ;;  %v993_v37 = vmul.f32 0.5, %v737_v25  ;;  %v739_v38 = vsub.f32 %v483_v21, %v227_v20  ;;  %v740_v39 = vsub.f32 %v484_v27, %v228_v26  ;;  %v231_v40 = vld [vmem:[%s2257_s19 + $0xc0] sm:$0xff]  ;;  %v1246_v43 = vadd.f32 %v990_v30, %v222_v62 }
  0x64   : > { %v487_v41 = vld [vmem:[%s2265_s29 + $0xc0] sm:$0xff]  ;;  %v232_v42 = vld [vmem:[%s2257_s19 + $0xc8] sm:$0xff]  ;;  %1501 = vst [vmem:[%s2293_s20 + $0x70] sm:$0xff] %v1245_v29  ;;  %v1247_v44 = vadd.f32 %v991_v31, %v223_v0  ;;  %v994_v45 = vmul.f32 0.5, %v738_v32  ;;  %v741_v46 = vsub.f32 %v485_v33, %v229_v28  ;;  %v233_v48 = vld [vmem:[%s2257_s19 + $0xd0] sm:$0xff]  ;;  %v1248_v50 = vadd.f32 %v992_v36, %v224_v6 }
  0x65   : > { %v488_v47 = vld [vmem:[%s2265_s29 + $0xc8] sm:$0xff]  ;;  %v489_v49 = vld [vmem:[%s2265_s29 + $0xd0] sm:$0xff]  ;;  %v1249_v51 = vadd.f32 %v993_v37, %v225_v12  ;;  %v995_v52 = vmul.f32 0.5, %v739_v38  ;;  %v996_v53 = vmul.f32 0.5, %v740_v39  ;;  %v234_v54 = vld [vmem:[%s2257_s19 + $0xd8] sm:$0xff]  ;;  %1502 = vst [vmem:[%s2293_s20 + $0x78] sm:$0xff] %v1246_v43  ;;  %v742_v59 = vsub.f32 %v486_v35, %v230_v34 }
  0x66   : > { %v490_v55 = vld [vmem:[%s2265_s29 + $0xd8] sm:$0xff]  ;;  %v235_v56 = vld [vmem:[%s2257_s19 + $0xe0] sm:$0xff]  ;;  %1503 = vst [vmem:[%s2293_s20 + $0x80] sm:$0xff] %v1247_v44  ;;  %v1250_v57 = vadd.f32 %v994_v45, %v226_v14  ;;  %v997_v58 = vmul.f32 0.5, %v741_v46  ;;  %v743_v60 = vsub.f32 %v487_v41, %v231_v40  ;;  %v236_v62 = vld [vmem:[%s2257_s19 + $0xe8] sm:$0xff]  ;;  %v744_v2 = vsub.f32 %v488_v47, %v232_v42 }
  0x67   : > { %v491_v61 = vld [vmem:[%s2265_s29 + $0xe0] sm:$0xff]  ;;  %v492_v63 = vld [vmem:[%s2265_s29 + $0xe8] sm:$0xff]  ;;  %1504 = vst [vmem:[%s2293_s20 + $0x88] sm:$0xff] %v1248_v50  ;;  %1505 = vst [vmem:[%s2293_s20 + $0x90] sm:$0xff] %v1249_v51  ;;  %v1251_v0 = vadd.f32 %v995_v52, %v227_v20  ;;  %v1252_v1 = vadd.f32 %v996_v53, %v228_v26  ;;  %v745_v3 = vsub.f32 %v489_v49, %v233_v48  ;;  %v998_v7 = vmul.f32 0.5, %v742_v59 }
  0x68   : > { %v237_v4 = vld [vmem:[%s2257_s19 + $0xf0] sm:$0xff]  ;;  %1506 = vst [vmem:[%s2293_s20 + $0x98] sm:$0xff] %v1250_v57  ;;  %v1253_v6 = vadd.f32 %v997_v58, %v229_v28  ;;  %v999_v8 = vmul.f32 0.5, %v743_v60  ;;  %v746_v9 = vsub.f32 %v490_v55, %v234_v54  ;;  %v238_v10 = vld [vmem:[%s2257_s19 + $0xf8] sm:$0xff]  ;;  %v1000_v12 = vmul.f32 0.5, %v744_v2  ;;  %v239_v16 = vld [vmem:[%s2257_s19 + $0x100] sm:$0xff] }
  0x69   : > { %v493_v5 = vld [vmem:[%s2265_s29 + $0xf0] sm:$0xff]  ;;  %v494_v11 = vld [vmem:[%s2265_s29 + $0xf8] sm:$0xff]  ;;  %1507 = vst [vmem:[%s2293_s20 + $0xa0] sm:$0xff] %v1251_v0  ;;  %1508 = vst [vmem:[%s2293_s20 + $0xa8] sm:$0xff] %v1252_v1  ;;  %v1001_v13 = vmul.f32 0.5, %v745_v3  ;;  %v747_v14 = vsub.f32 %v491_v61, %v235_v56  ;;  %v748_v15 = vsub.f32 %v492_v63, %v236_v62  ;;  %v1254_v19 = vadd.f32 %v998_v7, %v230_v34 }
  0x6a   : > { %v495_v17 = vld [vmem:[%s2265_s29 + $0x100] sm:$0xff]  ;;  %v240_v18 = vld [vmem:[%s2257_s19 + $0x108] sm:$0xff]  ;;  %1509 = vst [vmem:[%s2293_s20 + $0xb0] sm:$0xff] %v1253_v6  ;;  %v1255_v20 = vadd.f32 %v999_v8, %v231_v40  ;;  %v1002_v21 = vmul.f32 0.5, %v746_v9  ;;  %v749_v22 = vsub.f32 %v493_v5, %v237_v4  ;;  %v241_v24 = vld [vmem:[%s2257_s19 + $0x110] sm:$0xff]  ;;  %v1256_v26 = vadd.f32 %v1000_v12, %v232_v42 }
  0x6b   : > { %v496_v23 = vld [vmem:[%s2265_s29 + $0x108] sm:$0xff]  ;;  %v497_v25 = vld [vmem:[%s2265_s29 + $0x110] sm:$0xff]  ;;  %v1257_v27 = vadd.f32 %v1001_v13, %v233_v48  ;;  %v1003_v28 = vmul.f32 0.5, %v747_v14  ;;  %v1004_v29 = vmul.f32 0.5, %v748_v15  ;;  %v242_v30 = vld [vmem:[%s2257_s19 + $0x118] sm:$0xff]  ;;  %1510 = vst [vmem:[%s2293_s20 + $0xb8] sm:$0xff] %v1254_v19  ;;  %v750_v35 = vsub.f32 %v494_v11, %v238_v10 }
  0x6c   : > { %v498_v31 = vld [vmem:[%s2265_s29 + $0x118] sm:$0xff]  ;;  %v243_v32 = vld [vmem:[%s2257_s19 + $0x120] sm:$0xff]  ;;  %1511 = vst [vmem:[%s2293_s20 + $0xc0] sm:$0xff] %v1255_v20  ;;  %v1258_v33 = vadd.f32 %v1002_v21, %v234_v54  ;;  %v1005_v34 = vmul.f32 0.5, %v749_v22  ;;  %v751_v36 = vsub.f32 %v495_v17, %v239_v16  ;;  %v244_v38 = vld [vmem:[%s2257_s19 + $0x128] sm:$0xff]  ;;  %v752_v42 = vsub.f32 %v496_v23, %v240_v18 }
  0x6d   : > { %v499_v37 = vld [vmem:[%s2265_s29 + $0x120] sm:$0xff]  ;;  %v500_v39 = vld [vmem:[%s2265_s29 + $0x128] sm:$0xff]  ;;  %1512 = vst [vmem:[%s2293_s20 + $0xc8] sm:$0xff] %v1256_v26  ;;  %1513 = vst [vmem:[%s2293_s20 + $0xd0] sm:$0xff] %v1257_v27  ;;  %v1259_v40 = vadd.f32 %v1003_v28, %v235_v56  ;;  %v1260_v41 = vadd.f32 %v1004_v29, %v236_v62  ;;  %v753_v43 = vsub.f32 %v497_v25, %v241_v24  ;;  %v1006_v47 = vmul.f32 0.5, %v750_v35 }
  0x6e   : > { %v245_v44 = vld [vmem:[%s2257_s19 + $0x130] sm:$0xff]  ;;  %1514 = vst [vmem:[%s2293_s20 + $0xd8] sm:$0xff] %v1258_v33  ;;  %v1261_v46 = vadd.f32 %v1005_v34, %v237_v4  ;;  %v1007_v48 = vmul.f32 0.5, %v751_v36  ;;  %v754_v49 = vsub.f32 %v498_v31, %v242_v30  ;;  %v246_v50 = vld [vmem:[%s2257_s19 + $0x138] sm:$0xff]  ;;  %v1008_v52 = vmul.f32 0.5, %v752_v42  ;;  %v247_v56 = vld [vmem:[%s2257_s19 + $0x140] sm:$0xff] }
  0x6f   : > { %v501_v45 = vld [vmem:[%s2265_s29 + $0x130] sm:$0xff]  ;;  %v502_v51 = vld [vmem:[%s2265_s29 + $0x138] sm:$0xff]  ;;  %1515 = vst [vmem:[%s2293_s20 + $0xe0] sm:$0xff] %v1259_v40  ;;  %1516 = vst [vmem:[%s2293_s20 + $0xe8] sm:$0xff] %v1260_v41  ;;  %v1009_v53 = vmul.f32 0.5, %v753_v43  ;;  %v755_v54 = vsub.f32 %v499_v37, %v243_v32  ;;  %v756_v55 = vsub.f32 %v500_v39, %v244_v38  ;;  %v1262_v59 = vadd.f32 %v1006_v47, %v238_v10 }
  0x70   : > { %v503_v57 = vld [vmem:[%s2265_s29 + $0x140] sm:$0xff]  ;;  %v248_v58 = vld [vmem:[%s2257_s19 + $0x148] sm:$0xff]  ;;  %1517 = vst [vmem:[%s2293_s20 + $0xf0] sm:$0xff] %v1261_v46  ;;  %v1263_v60 = vadd.f32 %v1007_v48, %v239_v16  ;;  %v1010_v61 = vmul.f32 0.5, %v754_v49  ;;  %v757_v62 = vsub.f32 %v501_v45, %v245_v44  ;;  %v249_v0 = vld [vmem:[%s2257_s19 + $0x150] sm:$0xff]  ;;  %v1264_v2 = vadd.f32 %v1008_v52, %v240_v18 }
  0x71   : > { %v504_v63 = vld [vmem:[%s2265_s29 + $0x148] sm:$0xff]  ;;  %v505_v1 = vld [vmem:[%s2265_s29 + $0x150] sm:$0xff]  ;;  %v1265_v3 = vadd.f32 %v1009_v53, %v241_v24  ;;  %v1011_v4 = vmul.f32 0.5, %v755_v54  ;;  %v1012_v5 = vmul.f32 0.5, %v756_v55  ;;  %v250_v6 = vld [vmem:[%s2257_s19 + $0x158] sm:$0xff]  ;;  %1518 = vst [vmem:[%s2293_s20 + $0xf8] sm:$0xff] %v1262_v59  ;;  %v758_v11 = vsub.f32 %v502_v51, %v246_v50 }
  0x72   : > { %v506_v7 = vld [vmem:[%s2265_s29 + $0x158] sm:$0xff]  ;;  %v251_v8 = vld [vmem:[%s2257_s19 + $0x160] sm:$0xff]  ;;  %1519 = vst [vmem:[%s2293_s20 + $0x100] sm:$0xff] %v1263_v60  ;;  %v1266_v9 = vadd.f32 %v1010_v61, %v242_v30  ;;  %v1013_v10 = vmul.f32 0.5, %v757_v62  ;;  %v759_v12 = vsub.f32 %v503_v57, %v247_v56  ;;  %v252_v14 = vld [vmem:[%s2257_s19 + $0x168] sm:$0xff]  ;;  %v760_v18 = vsub.f32 %v504_v63, %v248_v58 }
  0x73   : > { %v507_v13 = vld [vmem:[%s2265_s29 + $0x160] sm:$0xff]  ;;  %v508_v15 = vld [vmem:[%s2265_s29 + $0x168] sm:$0xff]  ;;  %1520 = vst [vmem:[%s2293_s20 + $0x108] sm:$0xff] %v1264_v2  ;;  %1521 = vst [vmem:[%s2293_s20 + $0x110] sm:$0xff] %v1265_v3  ;;  %v1267_v16 = vadd.f32 %v1011_v4, %v243_v32  ;;  %v1268_v17 = vadd.f32 %v1012_v5, %v244_v38  ;;  %v761_v19 = vsub.f32 %v505_v1, %v249_v0  ;;  %v1014_v23 = vmul.f32 0.5, %v758_v11 }
  0x74   : > { %v253_v20 = vld [vmem:[%s2257_s19 + $0x170] sm:$0xff]  ;;  %1522 = vst [vmem:[%s2293_s20 + $0x118] sm:$0xff] %v1266_v9  ;;  %v1269_v22 = vadd.f32 %v1013_v10, %v245_v44  ;;  %v1015_v24 = vmul.f32 0.5, %v759_v12  ;;  %v762_v25 = vsub.f32 %v506_v7, %v250_v6  ;;  %v254_v26 = vld [vmem:[%s2257_s19 + $0x178] sm:$0xff]  ;;  %v1016_v28 = vmul.f32 0.5, %v760_v18  ;;  %v255_v32 = vld [vmem:[%s2257_s19 + $0x180] sm:$0xff] }
  0x75   : > { %v509_v21 = vld [vmem:[%s2265_s29 + $0x170] sm:$0xff]  ;;  %v510_v27 = vld [vmem:[%s2265_s29 + $0x178] sm:$0xff]  ;;  %1523 = vst [vmem:[%s2293_s20 + $0x120] sm:$0xff] %v1267_v16  ;;  %1524 = vst [vmem:[%s2293_s20 + $0x128] sm:$0xff] %v1268_v17  ;;  %v1017_v29 = vmul.f32 0.5, %v761_v19  ;;  %v763_v30 = vsub.f32 %v507_v13, %v251_v8  ;;  %v764_v31 = vsub.f32 %v508_v15, %v252_v14  ;;  %v1270_v35 = vadd.f32 %v1014_v23, %v246_v50 }
  0x76   : > { %v511_v33 = vld [vmem:[%s2265_s29 + $0x180] sm:$0xff]  ;;  %v256_v34 = vld [vmem:[%s2257_s19 + $0x188] sm:$0xff]  ;;  %1525 = vst [vmem:[%s2293_s20 + $0x130] sm:$0xff] %v1269_v22  ;;  %v1271_v36 = vadd.f32 %v1015_v24, %v247_v56  ;;  %v1018_v37 = vmul.f32 0.5, %v762_v25  ;;  %v765_v38 = vsub.f32 %v509_v21, %v253_v20  ;;  %v257_v40 = vld [vmem:[%s2257_s19 + $0x190] sm:$0xff]  ;;  %v1272_v42 = vadd.f32 %v1016_v28, %v248_v58 }
  0x77   : > { %v512_v39 = vld [vmem:[%s2265_s29 + $0x188] sm:$0xff]  ;;  %v513_v41 = vld [vmem:[%s2265_s29 + $0x190] sm:$0xff]  ;;  %v1273_v43 = vadd.f32 %v1017_v29, %v249_v0  ;;  %v1019_v44 = vmul.f32 0.5, %v763_v30  ;;  %v1020_v45 = vmul.f32 0.5, %v764_v31  ;;  %v258_v46 = vld [vmem:[%s2257_s19 + $0x198] sm:$0xff]  ;;  %1526 = vst [vmem:[%s2293_s20 + $0x138] sm:$0xff] %v1270_v35  ;;  %v766_v51 = vsub.f32 %v510_v27, %v254_v26 }
  0x78   : > { %v514_v47 = vld [vmem:[%s2265_s29 + $0x198] sm:$0xff]  ;;  %v259_v48 = vld [vmem:[%s2257_s19 + $0x1a0] sm:$0xff]  ;;  %1527 = vst [vmem:[%s2293_s20 + $0x140] sm:$0xff] %v1271_v36  ;;  %v1274_v49 = vadd.f32 %v1018_v37, %v250_v6  ;;  %v1021_v50 = vmul.f32 0.5, %v765_v38  ;;  %v767_v52 = vsub.f32 %v511_v33, %v255_v32  ;;  %v260_v54 = vld [vmem:[%s2257_s19 + $0x1a8] sm:$0xff]  ;;  %v768_v58 = vsub.f32 %v512_v39, %v256_v34 }
  0x79   : > { %v515_v53 = vld [vmem:[%s2265_s29 + $0x1a0] sm:$0xff]  ;;  %v516_v55 = vld [vmem:[%s2265_s29 + $0x1a8] sm:$0xff]  ;;  %1528 = vst [vmem:[%s2293_s20 + $0x148] sm:$0xff] %v1272_v42  ;;  %1529 = vst [vmem:[%s2293_s20 + $0x150] sm:$0xff] %v1273_v43  ;;  %v1275_v56 = vadd.f32 %v1019_v44, %v251_v8  ;;  %v1276_v57 = vadd.f32 %v1020_v45, %v252_v14  ;;  %v769_v59 = vsub.f32 %v513_v41, %v257_v40  ;;  %v1022_v63 = vmul.f32 0.5, %v766_v51 }
  0x7a   : > { %v261_v60 = vld [vmem:[%s2257_s19 + $0x1b0] sm:$0xff]  ;;  %1530 = vst [vmem:[%s2293_s20 + $0x158] sm:$0xff] %v1274_v49  ;;  %v1277_v62 = vadd.f32 %v1021_v50, %v253_v20  ;;  %v1023_v0 = vmul.f32 0.5, %v767_v52  ;;  %v770_v1 = vsub.f32 %v514_v47, %v258_v46  ;;  %v262_v2 = vld [vmem:[%s2257_s19 + $0x1b8] sm:$0xff]  ;;  %v1024_v4 = vmul.f32 0.5, %v768_v58  ;;  %v263_v8 = vld [vmem:[%s2257_s19 + $0x1c0] sm:$0xff] }
  0x7b   : > { %v517_v61 = vld [vmem:[%s2265_s29 + $0x1b0] sm:$0xff]  ;;  %v518_v3 = vld [vmem:[%s2265_s29 + $0x1b8] sm:$0xff]  ;;  %1531 = vst [vmem:[%s2293_s20 + $0x160] sm:$0xff] %v1275_v56  ;;  %1532 = vst [vmem:[%s2293_s20 + $0x168] sm:$0xff] %v1276_v57  ;;  %v1025_v5 = vmul.f32 0.5, %v769_v59  ;;  %v771_v6 = vsub.f32 %v515_v53, %v259_v48  ;;  %v772_v7 = vsub.f32 %v516_v55, %v260_v54  ;;  %v1278_v11 = vadd.f32 %v1022_v63, %v254_v26 }
  0x7c   : > { %v519_v9 = vld [vmem:[%s2265_s29 + $0x1c0] sm:$0xff]  ;;  %v264_v10 = vld [vmem:[%s2257_s19 + $0x1c8] sm:$0xff]  ;;  %1533 = vst [vmem:[%s2293_s20 + $0x170] sm:$0xff] %v1277_v62  ;;  %v1279_v12 = vadd.f32 %v1023_v0, %v255_v32  ;;  %v1026_v13 = vmul.f32 0.5, %v770_v1  ;;  %v773_v14 = vsub.f32 %v517_v61, %v261_v60  ;;  %v265_v16 = vld [vmem:[%s2257_s19 + $0x1d0] sm:$0xff]  ;;  %v1280_v18 = vadd.f32 %v1024_v4, %v256_v34 }
  0x7d   : > { %v520_v15 = vld [vmem:[%s2265_s29 + $0x1c8] sm:$0xff]  ;;  %v521_v17 = vld [vmem:[%s2265_s29 + $0x1d0] sm:$0xff]  ;;  %v1281_v19 = vadd.f32 %v1025_v5, %v257_v40  ;;  %v1027_v20 = vmul.f32 0.5, %v771_v6  ;;  %v1028_v21 = vmul.f32 0.5, %v772_v7  ;;  %v266_v22 = vld [vmem:[%s2257_s19 + $0x1d8] sm:$0xff]  ;;  %1534 = vst [vmem:[%s2293_s20 + $0x178] sm:$0xff] %v1278_v11  ;;  %v774_v27 = vsub.f32 %v518_v3, %v262_v2 }
  0x7e   : > { %v522_v23 = vld [vmem:[%s2265_s29 + $0x1d8] sm:$0xff]  ;;  %v267_v24 = vld [vmem:[%s2257_s19 + $0x1e0] sm:$0xff]  ;;  %1535 = vst [vmem:[%s2293_s20 + $0x180] sm:$0xff] %v1279_v12  ;;  %v1282_v25 = vadd.f32 %v1026_v13, %v258_v46  ;;  %v1029_v26 = vmul.f32 0.5, %v773_v14  ;;  %v775_v28 = vsub.f32 %v519_v9, %v263_v8  ;;  %v268_v30 = vld [vmem:[%s2257_s19 + $0x1e8] sm:$0xff]  ;;  %v776_v34 = vsub.f32 %v520_v15, %v264_v10 }
  0x7f   : > { %v523_v29 = vld [vmem:[%s2265_s29 + $0x1e0] sm:$0xff]  ;;  %v524_v31 = vld [vmem:[%s2265_s29 + $0x1e8] sm:$0xff]  ;;  %1536 = vst [vmem:[%s2293_s20 + $0x188] sm:$0xff] %v1280_v18  ;;  %1537 = vst [vmem:[%s2293_s20 + $0x190] sm:$0xff] %v1281_v19  ;;  %v1283_v32 = vadd.f32 %v1027_v20, %v259_v48  ;;  %v1284_v33 = vadd.f32 %v1028_v21, %v260_v54  ;;  %v777_v35 = vsub.f32 %v521_v17, %v265_v16  ;;  %v1030_v39 = vmul.f32 0.5, %v774_v27 }
  0x80   : > { %v269_v36 = vld [vmem:[%s2257_s19 + $0x1f0] sm:$0xff]  ;;  %1538 = vst [vmem:[%s2293_s20 + $0x198] sm:$0xff] %v1282_v25  ;;  %v1285_v38 = vadd.f32 %v1029_v26, %v261_v60  ;;  %v1031_v40 = vmul.f32 0.5, %v775_v28  ;;  %v778_v41 = vsub.f32 %v522_v23, %v266_v22  ;;  %v270_v42 = vld [vmem:[%s2257_s19 + $0x1f8] sm:$0xff]  ;;  %v1032_v44 = vmul.f32 0.5, %v776_v34  ;;  %v271_v48 = vld [vmem:[%s2257_s19 + $0x200] sm:$0xff] }
  0x81   : > { %v525_v37 = vld [vmem:[%s2265_s29 + $0x1f0] sm:$0xff]  ;;  %v526_v43 = vld [vmem:[%s2265_s29 + $0x1f8] sm:$0xff]  ;;  %1539 = vst [vmem:[%s2293_s20 + $0x1a0] sm:$0xff] %v1283_v32  ;;  %1540 = vst [vmem:[%s2293_s20 + $0x1a8] sm:$0xff] %v1284_v33  ;;  %v1033_v45 = vmul.f32 0.5, %v777_v35  ;;  %v779_v46 = vsub.f32 %v523_v29, %v267_v24  ;;  %v780_v47 = vsub.f32 %v524_v31, %v268_v30  ;;  %v1286_v51 = vadd.f32 %v1030_v39, %v262_v2 }
  0x82   : > { %v527_v49 = vld [vmem:[%s2265_s29 + $0x200] sm:$0xff]  ;;  %v272_v50 = vld [vmem:[%s2257_s19 + $0x208] sm:$0xff]  ;;  %1541 = vst [vmem:[%s2293_s20 + $0x1b0] sm:$0xff] %v1285_v38  ;;  %v1287_v52 = vadd.f32 %v1031_v40, %v263_v8  ;;  %v1034_v53 = vmul.f32 0.5, %v778_v41  ;;  %v781_v54 = vsub.f32 %v525_v37, %v269_v36  ;;  %v273_v56 = vld [vmem:[%s2257_s19 + $0x210] sm:$0xff]  ;;  %v1288_v58 = vadd.f32 %v1032_v44, %v264_v10 }
  0x83   : > { %v528_v55 = vld [vmem:[%s2265_s29 + $0x208] sm:$0xff]  ;;  %v529_v57 = vld [vmem:[%s2265_s29 + $0x210] sm:$0xff]  ;;  %v1289_v59 = vadd.f32 %v1033_v45, %v265_v16  ;;  %v1035_v60 = vmul.f32 0.5, %v779_v46  ;;  %v1036_v61 = vmul.f32 0.5, %v780_v47  ;;  %v274_v62 = vld [vmem:[%s2257_s19 + $0x218] sm:$0xff]  ;;  %1542 = vst [vmem:[%s2293_s20 + $0x1b8] sm:$0xff] %v1286_v51  ;;  %v782_v3 = vsub.f32 %v526_v43, %v270_v42 }
  0x84   : > { %v530_v63 = vld [vmem:[%s2265_s29 + $0x218] sm:$0xff]  ;;  %v275_v0 = vld [vmem:[%s2257_s19 + $0x220] sm:$0xff]  ;;  %1543 = vst [vmem:[%s2293_s20 + $0x1c0] sm:$0xff] %v1287_v52  ;;  %v1290_v1 = vadd.f32 %v1034_v53, %v266_v22  ;;  %v1037_v2 = vmul.f32 0.5, %v781_v54  ;;  %v783_v4 = vsub.f32 %v527_v49, %v271_v48  ;;  %v276_v6 = vld [vmem:[%s2257_s19 + $0x228] sm:$0xff]  ;;  %v784_v10 = vsub.f32 %v528_v55, %v272_v50 }
  0x85   : > { %v531_v5 = vld [vmem:[%s2265_s29 + $0x220] sm:$0xff]  ;;  %v532_v7 = vld [vmem:[%s2265_s29 + $0x228] sm:$0xff]  ;;  %1544 = vst [vmem:[%s2293_s20 + $0x1c8] sm:$0xff] %v1288_v58  ;;  %1545 = vst [vmem:[%s2293_s20 + $0x1d0] sm:$0xff] %v1289_v59  ;;  %v1291_v8 = vadd.f32 %v1035_v60, %v267_v24  ;;  %v1292_v9 = vadd.f32 %v1036_v61, %v268_v30  ;;  %v785_v11 = vsub.f32 %v529_v57, %v273_v56  ;;  %v1038_v15 = vmul.f32 0.5, %v782_v3 }
  0x86   : > { %v277_v12 = vld [vmem:[%s2257_s19 + $0x230] sm:$0xff]  ;;  %1546 = vst [vmem:[%s2293_s20 + $0x1d8] sm:$0xff] %v1290_v1  ;;  %v1293_v14 = vadd.f32 %v1037_v2, %v269_v36  ;;  %v1039_v16 = vmul.f32 0.5, %v783_v4  ;;  %v786_v17 = vsub.f32 %v530_v63, %v274_v62  ;;  %v278_v18 = vld [vmem:[%s2257_s19 + $0x238] sm:$0xff]  ;;  %v1040_v20 = vmul.f32 0.5, %v784_v10  ;;  %v279_v24 = vld [vmem:[%s2257_s19 + $0x240] sm:$0xff] }
  0x87   : > { %v533_v13 = vld [vmem:[%s2265_s29 + $0x230] sm:$0xff]  ;;  %v534_v19 = vld [vmem:[%s2265_s29 + $0x238] sm:$0xff]  ;;  %1547 = vst [vmem:[%s2293_s20 + $0x1e0] sm:$0xff] %v1291_v8  ;;  %1548 = vst [vmem:[%s2293_s20 + $0x1e8] sm:$0xff] %v1292_v9  ;;  %v1041_v21 = vmul.f32 0.5, %v785_v11  ;;  %v787_v22 = vsub.f32 %v531_v5, %v275_v0  ;;  %v788_v23 = vsub.f32 %v532_v7, %v276_v6  ;;  %v1294_v27 = vadd.f32 %v1038_v15, %v270_v42 }
  0x88   : > { %v535_v25 = vld [vmem:[%s2265_s29 + $0x240] sm:$0xff]  ;;  %v280_v26 = vld [vmem:[%s2257_s19 + $0x248] sm:$0xff]  ;;  %1549 = vst [vmem:[%s2293_s20 + $0x1f0] sm:$0xff] %v1293_v14  ;;  %v1295_v28 = vadd.f32 %v1039_v16, %v271_v48  ;;  %v1042_v29 = vmul.f32 0.5, %v786_v17  ;;  %v789_v30 = vsub.f32 %v533_v13, %v277_v12  ;;  %v281_v32 = vld [vmem:[%s2257_s19 + $0x250] sm:$0xff]  ;;  %v1296_v34 = vadd.f32 %v1040_v20, %v272_v50 }
  0x89   : > { %v536_v31 = vld [vmem:[%s2265_s29 + $0x248] sm:$0xff]  ;;  %v537_v33 = vld [vmem:[%s2265_s29 + $0x250] sm:$0xff]  ;;  %v1297_v35 = vadd.f32 %v1041_v21, %v273_v56  ;;  %v1043_v36 = vmul.f32 0.5, %v787_v22  ;;  %v1044_v37 = vmul.f32 0.5, %v788_v23  ;;  %v282_v38 = vld [vmem:[%s2257_s19 + $0x258] sm:$0xff]  ;;  %1550 = vst [vmem:[%s2293_s20 + $0x1f8] sm:$0xff] %v1294_v27  ;;  %v790_v43 = vsub.f32 %v534_v19, %v278_v18 }
  0x8a   : > { %v538_v39 = vld [vmem:[%s2265_s29 + $0x258] sm:$0xff]  ;;  %v283_v40 = vld [vmem:[%s2257_s19 + $0x260] sm:$0xff]  ;;  %1551 = vst [vmem:[%s2293_s20 + $0x200] sm:$0xff] %v1295_v28  ;;  %v1298_v41 = vadd.f32 %v1042_v29, %v274_v62  ;;  %v1045_v42 = vmul.f32 0.5, %v789_v30  ;;  %v791_v44 = vsub.f32 %v535_v25, %v279_v24  ;;  %v284_v46 = vld [vmem:[%s2257_s19 + $0x268] sm:$0xff]  ;;  %v792_v50 = vsub.f32 %v536_v31, %v280_v26 }
  0x8b   : > { %v539_v45 = vld [vmem:[%s2265_s29 + $0x260] sm:$0xff]  ;;  %v540_v47 = vld [vmem:[%s2265_s29 + $0x268] sm:$0xff]  ;;  %1552 = vst [vmem:[%s2293_s20 + $0x208] sm:$0xff] %v1296_v34  ;;  %1553 = vst [vmem:[%s2293_s20 + $0x210] sm:$0xff] %v1297_v35  ;;  %v1299_v48 = vadd.f32 %v1043_v36, %v275_v0  ;;  %v1300_v49 = vadd.f32 %v1044_v37, %v276_v6  ;;  %v793_v51 = vsub.f32 %v537_v33, %v281_v32  ;;  %v1046_v55 = vmul.f32 0.5, %v790_v43 }
  0x8c   : > { %v285_v52 = vld [vmem:[%s2257_s19 + $0x270] sm:$0xff]  ;;  %1554 = vst [vmem:[%s2293_s20 + $0x218] sm:$0xff] %v1298_v41  ;;  %v1301_v54 = vadd.f32 %v1045_v42, %v277_v12  ;;  %v1047_v56 = vmul.f32 0.5, %v791_v44  ;;  %v794_v57 = vsub.f32 %v538_v39, %v282_v38  ;;  %v286_v58 = vld [vmem:[%s2257_s19 + $0x278] sm:$0xff]  ;;  %v1048_v60 = vmul.f32 0.5, %v792_v50  ;;  %v287_v0 = vld [vmem:[%s2257_s19 + $0x280] sm:$0xff] }
  0x8d   : > { %v541_v53 = vld [vmem:[%s2265_s29 + $0x270] sm:$0xff]  ;;  %v542_v59 = vld [vmem:[%s2265_s29 + $0x278] sm:$0xff]  ;;  %1555 = vst [vmem:[%s2293_s20 + $0x220] sm:$0xff] %v1299_v48  ;;  %1556 = vst [vmem:[%s2293_s20 + $0x228] sm:$0xff] %v1300_v49  ;;  %v1049_v61 = vmul.f32 0.5, %v793_v51  ;;  %v795_v62 = vsub.f32 %v539_v45, %v283_v40  ;;  %v796_v63 = vsub.f32 %v540_v47, %v284_v46  ;;  %v1302_v3 = vadd.f32 %v1046_v55, %v278_v18 }
  0x8e   : > { %v543_v1 = vld [vmem:[%s2265_s29 + $0x280] sm:$0xff]  ;;  %v288_v2 = vld [vmem:[%s2257_s19 + $0x288] sm:$0xff]  ;;  %1557 = vst [vmem:[%s2293_s20 + $0x230] sm:$0xff] %v1301_v54  ;;  %v1303_v4 = vadd.f32 %v1047_v56, %v279_v24  ;;  %v1050_v5 = vmul.f32 0.5, %v794_v57  ;;  %v797_v6 = vsub.f32 %v541_v53, %v285_v52  ;;  %v289_v8 = vld [vmem:[%s2257_s19 + $0x290] sm:$0xff]  ;;  %v1304_v10 = vadd.f32 %v1048_v60, %v280_v26 }
  0x8f   : > { %v544_v7 = vld [vmem:[%s2265_s29 + $0x288] sm:$0xff]  ;;  %v545_v9 = vld [vmem:[%s2265_s29 + $0x290] sm:$0xff]  ;;  %v1305_v11 = vadd.f32 %v1049_v61, %v281_v32  ;;  %v1051_v12 = vmul.f32 0.5, %v795_v62  ;;  %v1052_v13 = vmul.f32 0.5, %v796_v63  ;;  %v290_v14 = vld [vmem:[%s2257_s19 + $0x298] sm:$0xff]  ;;  %1558 = vst [vmem:[%s2293_s20 + $0x238] sm:$0xff] %v1302_v3  ;;  %v798_v19 = vsub.f32 %v542_v59, %v286_v58 }
  0x90   : > { %v546_v15 = vld [vmem:[%s2265_s29 + $0x298] sm:$0xff]  ;;  %v291_v16 = vld [vmem:[%s2257_s19 + $0x2a0] sm:$0xff]  ;;  %1559 = vst [vmem:[%s2293_s20 + $0x240] sm:$0xff] %v1303_v4  ;;  %v1306_v17 = vadd.f32 %v1050_v5, %v282_v38  ;;  %v1053_v18 = vmul.f32 0.5, %v797_v6  ;;  %v799_v20 = vsub.f32 %v543_v1, %v287_v0  ;;  %v292_v22 = vld [vmem:[%s2257_s19 + $0x2a8] sm:$0xff]  ;;  %v800_v26 = vsub.f32 %v544_v7, %v288_v2 }
  0x91   : > { %v547_v21 = vld [vmem:[%s2265_s29 + $0x2a0] sm:$0xff]  ;;  %v548_v23 = vld [vmem:[%s2265_s29 + $0x2a8] sm:$0xff]  ;;  %1560 = vst [vmem:[%s2293_s20 + $0x248] sm:$0xff] %v1304_v10  ;;  %1561 = vst [vmem:[%s2293_s20 + $0x250] sm:$0xff] %v1305_v11  ;;  %v1307_v24 = vadd.f32 %v1051_v12, %v283_v40  ;;  %v1308_v25 = vadd.f32 %v1052_v13, %v284_v46  ;;  %v801_v27 = vsub.f32 %v545_v9, %v289_v8  ;;  %v1054_v31 = vmul.f32 0.5, %v798_v19 }
  0x92   : > { %v293_v28 = vld [vmem:[%s2257_s19 + $0x2b0] sm:$0xff]  ;;  %1562 = vst [vmem:[%s2293_s20 + $0x258] sm:$0xff] %v1306_v17  ;;  %v1309_v30 = vadd.f32 %v1053_v18, %v285_v52  ;;  %v1055_v32 = vmul.f32 0.5, %v799_v20  ;;  %v802_v33 = vsub.f32 %v546_v15, %v290_v14  ;;  %v294_v34 = vld [vmem:[%s2257_s19 + $0x2b8] sm:$0xff]  ;;  %v1056_v36 = vmul.f32 0.5, %v800_v26  ;;  %v295_v40 = vld [vmem:[%s2257_s19 + $0x2c0] sm:$0xff] }
  0x93   : > { %v549_v29 = vld [vmem:[%s2265_s29 + $0x2b0] sm:$0xff]  ;;  %v550_v35 = vld [vmem:[%s2265_s29 + $0x2b8] sm:$0xff]  ;;  %1563 = vst [vmem:[%s2293_s20 + $0x260] sm:$0xff] %v1307_v24  ;;  %1564 = vst [vmem:[%s2293_s20 + $0x268] sm:$0xff] %v1308_v25  ;;  %v1057_v37 = vmul.f32 0.5, %v801_v27  ;;  %v803_v38 = vsub.f32 %v547_v21, %v291_v16  ;;  %v804_v39 = vsub.f32 %v548_v23, %v292_v22  ;;  %v1310_v43 = vadd.f32 %v1054_v31, %v286_v58 }
  0x94   : > { %v551_v41 = vld [vmem:[%s2265_s29 + $0x2c0] sm:$0xff]  ;;  %v296_v42 = vld [vmem:[%s2257_s19 + $0x2c8] sm:$0xff]  ;;  %1565 = vst [vmem:[%s2293_s20 + $0x270] sm:$0xff] %v1309_v30  ;;  %v1311_v44 = vadd.f32 %v1055_v32, %v287_v0  ;;  %v1058_v45 = vmul.f32 0.5, %v802_v33  ;;  %v805_v46 = vsub.f32 %v549_v29, %v293_v28  ;;  %v297_v48 = vld [vmem:[%s2257_s19 + $0x2d0] sm:$0xff]  ;;  %v1312_v50 = vadd.f32 %v1056_v36, %v288_v2 }
  0x95   : > { %v552_v47 = vld [vmem:[%s2265_s29 + $0x2c8] sm:$0xff]  ;;  %v553_v49 = vld [vmem:[%s2265_s29 + $0x2d0] sm:$0xff]  ;;  %v1313_v51 = vadd.f32 %v1057_v37, %v289_v8  ;;  %v1059_v52 = vmul.f32 0.5, %v803_v38  ;;  %v1060_v53 = vmul.f32 0.5, %v804_v39  ;;  %v298_v54 = vld [vmem:[%s2257_s19 + $0x2d8] sm:$0xff]  ;;  %1566 = vst [vmem:[%s2293_s20 + $0x278] sm:$0xff] %v1310_v43  ;;  %v806_v59 = vsub.f32 %v550_v35, %v294_v34 }
  0x96   : > { %v554_v55 = vld [vmem:[%s2265_s29 + $0x2d8] sm:$0xff]  ;;  %v299_v56 = vld [vmem:[%s2257_s19 + $0x2e0] sm:$0xff]  ;;  %1567 = vst [vmem:[%s2293_s20 + $0x280] sm:$0xff] %v1311_v44  ;;  %v1314_v57 = vadd.f32 %v1058_v45, %v290_v14  ;;  %v1061_v58 = vmul.f32 0.5, %v805_v46  ;;  %v807_v60 = vsub.f32 %v551_v41, %v295_v40  ;;  %v300_v62 = vld [vmem:[%s2257_s19 + $0x2e8] sm:$0xff]  ;;  %v808_v2 = vsub.f32 %v552_v47, %v296_v42 }
  0x97   : > { %v555_v61 = vld [vmem:[%s2265_s29 + $0x2e0] sm:$0xff]  ;;  %v556_v63 = vld [vmem:[%s2265_s29 + $0x2e8] sm:$0xff]  ;;  %1568 = vst [vmem:[%s2293_s20 + $0x288] sm:$0xff] %v1312_v50  ;;  %1569 = vst [vmem:[%s2293_s20 + $0x290] sm:$0xff] %v1313_v51  ;;  %v1315_v0 = vadd.f32 %v1059_v52, %v291_v16  ;;  %v1316_v1 = vadd.f32 %v1060_v53, %v292_v22  ;;  %v809_v3 = vsub.f32 %v553_v49, %v297_v48  ;;  %v1062_v7 = vmul.f32 0.5, %v806_v59 }
  0x98   : > { %v301_v4 = vld [vmem:[%s2257_s19 + $0x2f0] sm:$0xff]  ;;  %1570 = vst [vmem:[%s2293_s20 + $0x298] sm:$0xff] %v1314_v57  ;;  %v1317_v6 = vadd.f32 %v1061_v58, %v293_v28  ;;  %v1063_v8 = vmul.f32 0.5, %v807_v60  ;;  %v810_v9 = vsub.f32 %v554_v55, %v298_v54  ;;  %v302_v10 = vld [vmem:[%s2257_s19 + $0x2f8] sm:$0xff]  ;;  %v1064_v12 = vmul.f32 0.5, %v808_v2  ;;  %v303_v16 = vld [vmem:[%s2257_s19 + $0x300] sm:$0xff] }
  0x99   : > { %v557_v5 = vld [vmem:[%s2265_s29 + $0x2f0] sm:$0xff]  ;;  %v558_v11 = vld [vmem:[%s2265_s29 + $0x2f8] sm:$0xff]  ;;  %1571 = vst [vmem:[%s2293_s20 + $0x2a0] sm:$0xff] %v1315_v0  ;;  %1572 = vst [vmem:[%s2293_s20 + $0x2a8] sm:$0xff] %v1316_v1  ;;  %v1065_v13 = vmul.f32 0.5, %v809_v3  ;;  %v811_v14 = vsub.f32 %v555_v61, %v299_v56  ;;  %v812_v15 = vsub.f32 %v556_v63, %v300_v62  ;;  %v1318_v19 = vadd.f32 %v1062_v7, %v294_v34 }
  0x9a   : > { %v559_v17 = vld [vmem:[%s2265_s29 + $0x300] sm:$0xff]  ;;  %v304_v18 = vld [vmem:[%s2257_s19 + $0x308] sm:$0xff]  ;;  %1573 = vst [vmem:[%s2293_s20 + $0x2b0] sm:$0xff] %v1317_v6  ;;  %v1319_v20 = vadd.f32 %v1063_v8, %v295_v40  ;;  %v1066_v21 = vmul.f32 0.5, %v810_v9  ;;  %v813_v22 = vsub.f32 %v557_v5, %v301_v4  ;;  %v305_v24 = vld [vmem:[%s2257_s19 + $0x310] sm:$0xff]  ;;  %v1320_v26 = vadd.f32 %v1064_v12, %v296_v42 }
  0x9b   : > { %v560_v23 = vld [vmem:[%s2265_s29 + $0x308] sm:$0xff]  ;;  %v561_v25 = vld [vmem:[%s2265_s29 + $0x310] sm:$0xff]  ;;  %v1321_v27 = vadd.f32 %v1065_v13, %v297_v48  ;;  %v1067_v28 = vmul.f32 0.5, %v811_v14  ;;  %v1068_v29 = vmul.f32 0.5, %v812_v15  ;;  %v306_v30 = vld [vmem:[%s2257_s19 + $0x318] sm:$0xff]  ;;  %1574 = vst [vmem:[%s2293_s20 + $0x2b8] sm:$0xff] %v1318_v19  ;;  %v814_v35 = vsub.f32 %v558_v11, %v302_v10 }
  0x9c   : > { %v562_v31 = vld [vmem:[%s2265_s29 + $0x318] sm:$0xff]  ;;  %v307_v32 = vld [vmem:[%s2257_s19 + $0x320] sm:$0xff]  ;;  %1575 = vst [vmem:[%s2293_s20 + $0x2c0] sm:$0xff] %v1319_v20  ;;  %v1322_v33 = vadd.f32 %v1066_v21, %v298_v54  ;;  %v1069_v34 = vmul.f32 0.5, %v813_v22  ;;  %v815_v36 = vsub.f32 %v559_v17, %v303_v16  ;;  %v308_v38 = vld [vmem:[%s2257_s19 + $0x328] sm:$0xff]  ;;  %v816_v42 = vsub.f32 %v560_v23, %v304_v18 }
  0x9d   : > { %v563_v37 = vld [vmem:[%s2265_s29 + $0x320] sm:$0xff]  ;;  %v564_v39 = vld [vmem:[%s2265_s29 + $0x328] sm:$0xff]  ;;  %1576 = vst [vmem:[%s2293_s20 + $0x2c8] sm:$0xff] %v1320_v26  ;;  %1577 = vst [vmem:[%s2293_s20 + $0x2d0] sm:$0xff] %v1321_v27  ;;  %v1323_v40 = vadd.f32 %v1067_v28, %v299_v56  ;;  %v1324_v41 = vadd.f32 %v1068_v29, %v300_v62  ;;  %v817_v43 = vsub.f32 %v561_v25, %v305_v24  ;;  %v1070_v47 = vmul.f32 0.5, %v814_v35 }
  0x9e   : > { %v309_v44 = vld [vmem:[%s2257_s19 + $0x330] sm:$0xff]  ;;  %1578 = vst [vmem:[%s2293_s20 + $0x2d8] sm:$0xff] %v1322_v33  ;;  %v1325_v46 = vadd.f32 %v1069_v34, %v301_v4  ;;  %v1071_v48 = vmul.f32 0.5, %v815_v36  ;;  %v818_v49 = vsub.f32 %v562_v31, %v306_v30  ;;  %v310_v50 = vld [vmem:[%s2257_s19 + $0x338] sm:$0xff]  ;;  %v1072_v52 = vmul.f32 0.5, %v816_v42  ;;  %v311_v56 = vld [vmem:[%s2257_s19 + $0x340] sm:$0xff] }
  0x9f   : > { %v565_v45 = vld [vmem:[%s2265_s29 + $0x330] sm:$0xff]  ;;  %v566_v51 = vld [vmem:[%s2265_s29 + $0x338] sm:$0xff]  ;;  %1579 = vst [vmem:[%s2293_s20 + $0x2e0] sm:$0xff] %v1323_v40  ;;  %1580 = vst [vmem:[%s2293_s20 + $0x2e8] sm:$0xff] %v1324_v41  ;;  %v1073_v53 = vmul.f32 0.5, %v817_v43  ;;  %v819_v54 = vsub.f32 %v563_v37, %v307_v32  ;;  %v820_v55 = vsub.f32 %v564_v39, %v308_v38  ;;  %v1326_v59 = vadd.f32 %v1070_v47, %v302_v10 }
  0xa0   : > { %v567_v57 = vld [vmem:[%s2265_s29 + $0x340] sm:$0xff]  ;;  %v312_v58 = vld [vmem:[%s2257_s19 + $0x348] sm:$0xff]  ;;  %1581 = vst [vmem:[%s2293_s20 + $0x2f0] sm:$0xff] %v1325_v46  ;;  %v1327_v60 = vadd.f32 %v1071_v48, %v303_v16  ;;  %v1074_v61 = vmul.f32 0.5, %v818_v49  ;;  %v821_v62 = vsub.f32 %v565_v45, %v309_v44  ;;  %v313_v0 = vld [vmem:[%s2257_s19 + $0x350] sm:$0xff]  ;;  %v1328_v2 = vadd.f32 %v1072_v52, %v304_v18 }
  0xa1   : > { %v568_v63 = vld [vmem:[%s2265_s29 + $0x348] sm:$0xff]  ;;  %v569_v1 = vld [vmem:[%s2265_s29 + $0x350] sm:$0xff]  ;;  %v1329_v3 = vadd.f32 %v1073_v53, %v305_v24  ;;  %v1075_v4 = vmul.f32 0.5, %v819_v54  ;;  %v1076_v5 = vmul.f32 0.5, %v820_v55  ;;  %v314_v6 = vld [vmem:[%s2257_s19 + $0x358] sm:$0xff]  ;;  %1582 = vst [vmem:[%s2293_s20 + $0x2f8] sm:$0xff] %v1326_v59  ;;  %v822_v11 = vsub.f32 %v566_v51, %v310_v50 }
  0xa2   : > { %v570_v7 = vld [vmem:[%s2265_s29 + $0x358] sm:$0xff]  ;;  %v315_v8 = vld [vmem:[%s2257_s19 + $0x360] sm:$0xff]  ;;  %1583 = vst [vmem:[%s2293_s20 + $0x300] sm:$0xff] %v1327_v60  ;;  %v1330_v9 = vadd.f32 %v1074_v61, %v306_v30  ;;  %v1077_v10 = vmul.f32 0.5, %v821_v62  ;;  %v823_v12 = vsub.f32 %v567_v57, %v311_v56  ;;  %v316_v14 = vld [vmem:[%s2257_s19 + $0x368] sm:$0xff]  ;;  %v824_v18 = vsub.f32 %v568_v63, %v312_v58 }
  0xa3   : > { %v571_v13 = vld [vmem:[%s2265_s29 + $0x360] sm:$0xff]  ;;  %v572_v15 = vld [vmem:[%s2265_s29 + $0x368] sm:$0xff]  ;;  %1584 = vst [vmem:[%s2293_s20 + $0x308] sm:$0xff] %v1328_v2  ;;  %1585 = vst [vmem:[%s2293_s20 + $0x310] sm:$0xff] %v1329_v3  ;;  %v1331_v16 = vadd.f32 %v1075_v4, %v307_v32  ;;  %v1332_v17 = vadd.f32 %v1076_v5, %v308_v38  ;;  %v825_v19 = vsub.f32 %v569_v1, %v313_v0  ;;  %v1078_v23 = vmul.f32 0.5, %v822_v11 }
  0xa4   : > { %v317_v20 = vld [vmem:[%s2257_s19 + $0x370] sm:$0xff]  ;;  %1586 = vst [vmem:[%s2293_s20 + $0x318] sm:$0xff] %v1330_v9  ;;  %v1333_v22 = vadd.f32 %v1077_v10, %v309_v44  ;;  %v1079_v24 = vmul.f32 0.5, %v823_v12  ;;  %v826_v25 = vsub.f32 %v570_v7, %v314_v6  ;;  %v318_v26 = vld [vmem:[%s2257_s19 + $0x378] sm:$0xff]  ;;  %v1080_v28 = vmul.f32 0.5, %v824_v18  ;;  %v319_v32 = vld [vmem:[%s2257_s19 + $0x380] sm:$0xff] }
  0xa5   : > { %v573_v21 = vld [vmem:[%s2265_s29 + $0x370] sm:$0xff]  ;;  %v574_v27 = vld [vmem:[%s2265_s29 + $0x378] sm:$0xff]  ;;  %1587 = vst [vmem:[%s2293_s20 + $0x320] sm:$0xff] %v1331_v16  ;;  %1588 = vst [vmem:[%s2293_s20 + $0x328] sm:$0xff] %v1332_v17  ;;  %v1081_v29 = vmul.f32 0.5, %v825_v19  ;;  %v827_v30 = vsub.f32 %v571_v13, %v315_v8  ;;  %v828_v31 = vsub.f32 %v572_v15, %v316_v14  ;;  %v1334_v35 = vadd.f32 %v1078_v23, %v310_v50 }
  0xa6   : > { %v575_v33 = vld [vmem:[%s2265_s29 + $0x380] sm:$0xff]  ;;  %v320_v34 = vld [vmem:[%s2257_s19 + $0x388] sm:$0xff]  ;;  %1589 = vst [vmem:[%s2293_s20 + $0x330] sm:$0xff] %v1333_v22  ;;  %v1335_v36 = vadd.f32 %v1079_v24, %v311_v56  ;;  %v1082_v37 = vmul.f32 0.5, %v826_v25  ;;  %v829_v38 = vsub.f32 %v573_v21, %v317_v20  ;;  %v321_v40 = vld [vmem:[%s2257_s19 + $0x390] sm:$0xff]  ;;  %v1336_v42 = vadd.f32 %v1080_v28, %v312_v58 }
  0xa7   : > { %v576_v39 = vld [vmem:[%s2265_s29 + $0x388] sm:$0xff]  ;;  %v577_v41 = vld [vmem:[%s2265_s29 + $0x390] sm:$0xff]  ;;  %v1337_v43 = vadd.f32 %v1081_v29, %v313_v0  ;;  %v1083_v44 = vmul.f32 0.5, %v827_v30  ;;  %v1084_v45 = vmul.f32 0.5, %v828_v31  ;;  %v322_v46 = vld [vmem:[%s2257_s19 + $0x398] sm:$0xff]  ;;  %1590 = vst [vmem:[%s2293_s20 + $0x338] sm:$0xff] %v1334_v35  ;;  %v830_v51 = vsub.f32 %v574_v27, %v318_v26 }
  0xa8   : > { %v578_v47 = vld [vmem:[%s2265_s29 + $0x398] sm:$0xff]  ;;  %v323_v48 = vld [vmem:[%s2257_s19 + $0x3a0] sm:$0xff]  ;;  %1591 = vst [vmem:[%s2293_s20 + $0x340] sm:$0xff] %v1335_v36  ;;  %v1338_v49 = vadd.f32 %v1082_v37, %v314_v6  ;;  %v1085_v50 = vmul.f32 0.5, %v829_v38  ;;  %v831_v52 = vsub.f32 %v575_v33, %v319_v32  ;;  %v324_v54 = vld [vmem:[%s2257_s19 + $0x3a8] sm:$0xff]  ;;  %v832_v58 = vsub.f32 %v576_v39, %v320_v34 }
  0xa9   : > { %v579_v53 = vld [vmem:[%s2265_s29 + $0x3a0] sm:$0xff]  ;;  %v580_v55 = vld [vmem:[%s2265_s29 + $0x3a8] sm:$0xff]  ;;  %1592 = vst [vmem:[%s2293_s20 + $0x348] sm:$0xff] %v1336_v42  ;;  %1593 = vst [vmem:[%s2293_s20 + $0x350] sm:$0xff] %v1337_v43  ;;  %v1339_v56 = vadd.f32 %v1083_v44, %v315_v8  ;;  %v1340_v57 = vadd.f32 %v1084_v45, %v316_v14  ;;  %v833_v59 = vsub.f32 %v577_v41, %v321_v40  ;;  %v1086_v63 = vmul.f32 0.5, %v830_v51 }
  0xaa   : > { %v325_v60 = vld [vmem:[%s2257_s19 + $0x3b0] sm:$0xff]  ;;  %1594 = vst [vmem:[%s2293_s20 + $0x358] sm:$0xff] %v1338_v49  ;;  %v1341_v62 = vadd.f32 %v1085_v50, %v317_v20  ;;  %v1087_v0 = vmul.f32 0.5, %v831_v52  ;;  %v834_v1 = vsub.f32 %v578_v47, %v322_v46  ;;  %v326_v2 = vld [vmem:[%s2257_s19 + $0x3b8] sm:$0xff]  ;;  %v1088_v4 = vmul.f32 0.5, %v832_v58  ;;  %v327_v8 = vld [vmem:[%s2257_s19 + $0x3c0] sm:$0xff] }
  0xab   : > { %v581_v61 = vld [vmem:[%s2265_s29 + $0x3b0] sm:$0xff]  ;;  %v582_v3 = vld [vmem:[%s2265_s29 + $0x3b8] sm:$0xff]  ;;  %1595 = vst [vmem:[%s2293_s20 + $0x360] sm:$0xff] %v1339_v56  ;;  %1596 = vst [vmem:[%s2293_s20 + $0x368] sm:$0xff] %v1340_v57  ;;  %v1089_v5 = vmul.f32 0.5, %v833_v59  ;;  %v835_v6 = vsub.f32 %v579_v53, %v323_v48  ;;  %v836_v7 = vsub.f32 %v580_v55, %v324_v54  ;;  %v1342_v11 = vadd.f32 %v1086_v63, %v318_v26 }
  0xac   : > { %v583_v9 = vld [vmem:[%s2265_s29 + $0x3c0] sm:$0xff]  ;;  %v328_v10 = vld [vmem:[%s2257_s19 + $0x3c8] sm:$0xff]  ;;  %1597 = vst [vmem:[%s2293_s20 + $0x370] sm:$0xff] %v1341_v62  ;;  %v1343_v12 = vadd.f32 %v1087_v0, %v319_v32  ;;  %v1090_v13 = vmul.f32 0.5, %v834_v1  ;;  %v837_v14 = vsub.f32 %v581_v61, %v325_v60  ;;  %v329_v16 = vld [vmem:[%s2257_s19 + $0x3d0] sm:$0xff]  ;;  %v1344_v18 = vadd.f32 %v1088_v4, %v320_v34 }
  0xad   : > { %v584_v15 = vld [vmem:[%s2265_s29 + $0x3c8] sm:$0xff]  ;;  %v585_v17 = vld [vmem:[%s2265_s29 + $0x3d0] sm:$0xff]  ;;  %v1345_v19 = vadd.f32 %v1089_v5, %v321_v40  ;;  %v1091_v20 = vmul.f32 0.5, %v835_v6  ;;  %v1092_v21 = vmul.f32 0.5, %v836_v7  ;;  %v330_v22 = vld [vmem:[%s2257_s19 + $0x3d8] sm:$0xff]  ;;  %1598 = vst [vmem:[%s2293_s20 + $0x378] sm:$0xff] %v1342_v11  ;;  %v838_v27 = vsub.f32 %v582_v3, %v326_v2 }
  0xae   : > { %v586_v23 = vld [vmem:[%s2265_s29 + $0x3d8] sm:$0xff]  ;;  %v331_v24 = vld [vmem:[%s2257_s19 + $0x3e0] sm:$0xff]  ;;  %1599 = vst [vmem:[%s2293_s20 + $0x380] sm:$0xff] %v1343_v12  ;;  %v1346_v25 = vadd.f32 %v1090_v13, %v322_v46  ;;  %v1093_v26 = vmul.f32 0.5, %v837_v14  ;;  %v839_v28 = vsub.f32 %v583_v9, %v327_v8  ;;  %v332_v30 = vld [vmem:[%s2257_s19 + $0x3e8] sm:$0xff]  ;;  %v840_v34 = vsub.f32 %v584_v15, %v328_v10 }
  0xaf   : > { %v587_v29 = vld [vmem:[%s2265_s29 + $0x3e0] sm:$0xff]  ;;  %v588_v31 = vld [vmem:[%s2265_s29 + $0x3e8] sm:$0xff]  ;;  %1600 = vst [vmem:[%s2293_s20 + $0x388] sm:$0xff] %v1344_v18  ;;  %1601 = vst [vmem:[%s2293_s20 + $0x390] sm:$0xff] %v1345_v19  ;;  %v1347_v32 = vadd.f32 %v1091_v20, %v323_v48  ;;  %v1348_v33 = vadd.f32 %v1092_v21, %v324_v54  ;;  %v841_v35 = vsub.f32 %v585_v17, %v329_v16  ;;  %v1094_v39 = vmul.f32 0.5, %v838_v27 }
  0xb0   : > { %v333_v36 = vld [vmem:[%s2257_s19 + $0x3f0] sm:$0xff]  ;;  %1602 = vst [vmem:[%s2293_s20 + $0x398] sm:$0xff] %v1346_v25  ;;  %v1349_v38 = vadd.f32 %v1093_v26, %v325_v60  ;;  %v1095_v40 = vmul.f32 0.5, %v839_v28  ;;  %v842_v41 = vsub.f32 %v586_v23, %v330_v22  ;;  %v334_v42 = vld [vmem:[%s2257_s19 + $0x3f8] sm:$0xff]  ;;  %v1096_v44 = vmul.f32 0.5, %v840_v34  ;;  %v335_v48 = vld [vmem:[%s2257_s19 + $0x400] sm:$0xff] }
  0xb1   : > { %v589_v37 = vld [vmem:[%s2265_s29 + $0x3f0] sm:$0xff]  ;;  %v590_v43 = vld [vmem:[%s2265_s29 + $0x3f8] sm:$0xff]  ;;  %1603 = vst [vmem:[%s2293_s20 + $0x3a0] sm:$0xff] %v1347_v32  ;;  %1604 = vst [vmem:[%s2293_s20 + $0x3a8] sm:$0xff] %v1348_v33  ;;  %v1097_v45 = vmul.f32 0.5, %v841_v35  ;;  %v843_v46 = vsub.f32 %v587_v29, %v331_v24  ;;  %v844_v47 = vsub.f32 %v588_v31, %v332_v30  ;;  %v1350_v51 = vadd.f32 %v1094_v39, %v326_v2 }
  0xb2   : > { %v591_v49 = vld [vmem:[%s2265_s29 + $0x400] sm:$0xff]  ;;  %v336_v50 = vld [vmem:[%s2257_s19 + $0x408] sm:$0xff]  ;;  %1605 = vst [vmem:[%s2293_s20 + $0x3b0] sm:$0xff] %v1349_v38  ;;  %v1351_v52 = vadd.f32 %v1095_v40, %v327_v8  ;;  %v1098_v53 = vmul.f32 0.5, %v842_v41  ;;  %v845_v54 = vsub.f32 %v589_v37, %v333_v36  ;;  %v337_v56 = vld [vmem:[%s2257_s19 + $0x410] sm:$0xff]  ;;  %v1352_v58 = vadd.f32 %v1096_v44, %v328_v10 }
  0xb3   : > { %v592_v55 = vld [vmem:[%s2265_s29 + $0x408] sm:$0xff]  ;;  %v593_v57 = vld [vmem:[%s2265_s29 + $0x410] sm:$0xff]  ;;  %v1353_v59 = vadd.f32 %v1097_v45, %v329_v16  ;;  %v1099_v60 = vmul.f32 0.5, %v843_v46  ;;  %v1100_v61 = vmul.f32 0.5, %v844_v47  ;;  %v338_v62 = vld [vmem:[%s2257_s19 + $0x418] sm:$0xff]  ;;  %1606 = vst [vmem:[%s2293_s20 + $0x3b8] sm:$0xff] %v1350_v51  ;;  %v846_v3 = vsub.f32 %v590_v43, %v334_v42 }
  0xb4   : > { %v594_v63 = vld [vmem:[%s2265_s29 + $0x418] sm:$0xff]  ;;  %v339_v0 = vld [vmem:[%s2257_s19 + $0x420] sm:$0xff]  ;;  %1607 = vst [vmem:[%s2293_s20 + $0x3c0] sm:$0xff] %v1351_v52  ;;  %v1354_v1 = vadd.f32 %v1098_v53, %v330_v22  ;;  %v1101_v2 = vmul.f32 0.5, %v845_v54  ;;  %v847_v4 = vsub.f32 %v591_v49, %v335_v48  ;;  %v340_v6 = vld [vmem:[%s2257_s19 + $0x428] sm:$0xff]  ;;  %v848_v10 = vsub.f32 %v592_v55, %v336_v50 }
  0xb5   : > { %v595_v5 = vld [vmem:[%s2265_s29 + $0x420] sm:$0xff]  ;;  %v596_v7 = vld [vmem:[%s2265_s29 + $0x428] sm:$0xff]  ;;  %1608 = vst [vmem:[%s2293_s20 + $0x3c8] sm:$0xff] %v1352_v58  ;;  %1609 = vst [vmem:[%s2293_s20 + $0x3d0] sm:$0xff] %v1353_v59  ;;  %v1355_v8 = vadd.f32 %v1099_v60, %v331_v24  ;;  %v1356_v9 = vadd.f32 %v1100_v61, %v332_v30  ;;  %v849_v11 = vsub.f32 %v593_v57, %v337_v56  ;;  %v1102_v15 = vmul.f32 0.5, %v846_v3 }
  0xb6   : > { %v341_v12 = vld [vmem:[%s2257_s19 + $0x430] sm:$0xff]  ;;  %1610 = vst [vmem:[%s2293_s20 + $0x3d8] sm:$0xff] %v1354_v1  ;;  %v1357_v14 = vadd.f32 %v1101_v2, %v333_v36  ;;  %v1103_v16 = vmul.f32 0.5, %v847_v4  ;;  %v850_v17 = vsub.f32 %v594_v63, %v338_v62  ;;  %v342_v18 = vld [vmem:[%s2257_s19 + $0x438] sm:$0xff]  ;;  %v1104_v20 = vmul.f32 0.5, %v848_v10  ;;  %v343_v24 = vld [vmem:[%s2257_s19 + $0x440] sm:$0xff] }
  0xb7   : > { %v597_v13 = vld [vmem:[%s2265_s29 + $0x430] sm:$0xff]  ;;  %v598_v19 = vld [vmem:[%s2265_s29 + $0x438] sm:$0xff]  ;;  %1611 = vst [vmem:[%s2293_s20 + $0x3e0] sm:$0xff] %v1355_v8  ;;  %1612 = vst [vmem:[%s2293_s20 + $0x3e8] sm:$0xff] %v1356_v9  ;;  %v1105_v21 = vmul.f32 0.5, %v849_v11  ;;  %v851_v22 = vsub.f32 %v595_v5, %v339_v0  ;;  %v852_v23 = vsub.f32 %v596_v7, %v340_v6  ;;  %v1358_v27 = vadd.f32 %v1102_v15, %v334_v42 }
  0xb8   : > { %v599_v25 = vld [vmem:[%s2265_s29 + $0x440] sm:$0xff]  ;;  %v344_v26 = vld [vmem:[%s2257_s19 + $0x448] sm:$0xff]  ;;  %1613 = vst [vmem:[%s2293_s20 + $0x3f0] sm:$0xff] %v1357_v14  ;;  %v1359_v28 = vadd.f32 %v1103_v16, %v335_v48  ;;  %v1106_v29 = vmul.f32 0.5, %v850_v17  ;;  %v853_v30 = vsub.f32 %v597_v13, %v341_v12  ;;  %v345_v32 = vld [vmem:[%s2257_s19 + $0x450] sm:$0xff]  ;;  %v1360_v34 = vadd.f32 %v1104_v20, %v336_v50 }
  0xb9   : > { %v600_v31 = vld [vmem:[%s2265_s29 + $0x448] sm:$0xff]  ;;  %v601_v33 = vld [vmem:[%s2265_s29 + $0x450] sm:$0xff]  ;;  %v1361_v35 = vadd.f32 %v1105_v21, %v337_v56  ;;  %v1107_v36 = vmul.f32 0.5, %v851_v22  ;;  %v1108_v37 = vmul.f32 0.5, %v852_v23  ;;  %v346_v38 = vld [vmem:[%s2257_s19 + $0x458] sm:$0xff]  ;;  %1614 = vst [vmem:[%s2293_s20 + $0x3f8] sm:$0xff] %v1358_v27  ;;  %v854_v43 = vsub.f32 %v598_v19, %v342_v18 }
  0xba   : > { %v602_v39 = vld [vmem:[%s2265_s29 + $0x458] sm:$0xff]  ;;  %v347_v40 = vld [vmem:[%s2257_s19 + $0x460] sm:$0xff]  ;;  %1615 = vst [vmem:[%s2293_s20 + $0x400] sm:$0xff] %v1359_v28  ;;  %v1362_v41 = vadd.f32 %v1106_v29, %v338_v62  ;;  %v1109_v42 = vmul.f32 0.5, %v853_v30  ;;  %v855_v44 = vsub.f32 %v599_v25, %v343_v24  ;;  %v348_v46 = vld [vmem:[%s2257_s19 + $0x468] sm:$0xff]  ;;  %v856_v50 = vsub.f32 %v600_v31, %v344_v26 }
  0xbb   : > { %v603_v45 = vld [vmem:[%s2265_s29 + $0x460] sm:$0xff]  ;;  %v604_v47 = vld [vmem:[%s2265_s29 + $0x468] sm:$0xff]  ;;  %1616 = vst [vmem:[%s2293_s20 + $0x408] sm:$0xff] %v1360_v34  ;;  %1617 = vst [vmem:[%s2293_s20 + $0x410] sm:$0xff] %v1361_v35  ;;  %v1363_v48 = vadd.f32 %v1107_v36, %v339_v0  ;;  %v1364_v49 = vadd.f32 %v1108_v37, %v340_v6  ;;  %v857_v51 = vsub.f32 %v601_v33, %v345_v32  ;;  %v1110_v55 = vmul.f32 0.5, %v854_v43 }
  0xbc   : > { %v349_v52 = vld [vmem:[%s2257_s19 + $0x470] sm:$0xff]  ;;  %1618 = vst [vmem:[%s2293_s20 + $0x418] sm:$0xff] %v1362_v41  ;;  %v1365_v54 = vadd.f32 %v1109_v42, %v341_v12  ;;  %v1111_v56 = vmul.f32 0.5, %v855_v44  ;;  %v858_v57 = vsub.f32 %v602_v39, %v346_v38  ;;  %v350_v58 = vld [vmem:[%s2257_s19 + $0x478] sm:$0xff]  ;;  %v1112_v60 = vmul.f32 0.5, %v856_v50  ;;  %v351_v0 = vld [vmem:[%s2257_s19 + $0x480] sm:$0xff] }
  0xbd   : > { %v605_v53 = vld [vmem:[%s2265_s29 + $0x470] sm:$0xff]  ;;  %v606_v59 = vld [vmem:[%s2265_s29 + $0x478] sm:$0xff]  ;;  %1619 = vst [vmem:[%s2293_s20 + $0x420] sm:$0xff] %v1363_v48  ;;  %1620 = vst [vmem:[%s2293_s20 + $0x428] sm:$0xff] %v1364_v49  ;;  %v1113_v61 = vmul.f32 0.5, %v857_v51  ;;  %v859_v62 = vsub.f32 %v603_v45, %v347_v40  ;;  %v860_v63 = vsub.f32 %v604_v47, %v348_v46  ;;  %v1366_v3 = vadd.f32 %v1110_v55, %v342_v18 }
  0xbe   : > { %v607_v1 = vld [vmem:[%s2265_s29 + $0x480] sm:$0xff]  ;;  %v352_v2 = vld [vmem:[%s2257_s19 + $0x488] sm:$0xff]  ;;  %1621 = vst [vmem:[%s2293_s20 + $0x430] sm:$0xff] %v1365_v54  ;;  %v1367_v4 = vadd.f32 %v1111_v56, %v343_v24  ;;  %v1114_v5 = vmul.f32 0.5, %v858_v57  ;;  %v861_v6 = vsub.f32 %v605_v53, %v349_v52  ;;  %v353_v8 = vld [vmem:[%s2257_s19 + $0x490] sm:$0xff]  ;;  %v1368_v10 = vadd.f32 %v1112_v60, %v344_v26 }
  0xbf   : > { %v608_v7 = vld [vmem:[%s2265_s29 + $0x488] sm:$0xff]  ;;  %v609_v9 = vld [vmem:[%s2265_s29 + $0x490] sm:$0xff]  ;;  %v1369_v11 = vadd.f32 %v1113_v61, %v345_v32  ;;  %v1115_v12 = vmul.f32 0.5, %v859_v62  ;;  %v1116_v13 = vmul.f32 0.5, %v860_v63  ;;  %v354_v14 = vld [vmem:[%s2257_s19 + $0x498] sm:$0xff]  ;;  %1622 = vst [vmem:[%s2293_s20 + $0x438] sm:$0xff] %v1366_v3  ;;  %v862_v19 = vsub.f32 %v606_v59, %v350_v58 }
  0xc0   : > { %v610_v15 = vld [vmem:[%s2265_s29 + $0x498] sm:$0xff]  ;;  %v355_v16 = vld [vmem:[%s2257_s19 + $0x4a0] sm:$0xff]  ;;  %1623 = vst [vmem:[%s2293_s20 + $0x440] sm:$0xff] %v1367_v4  ;;  %v1370_v17 = vadd.f32 %v1114_v5, %v346_v38  ;;  %v1117_v18 = vmul.f32 0.5, %v861_v6  ;;  %v863_v20 = vsub.f32 %v607_v1, %v351_v0  ;;  %v356_v22 = vld [vmem:[%s2257_s19 + $0x4a8] sm:$0xff]  ;;  %v864_v26 = vsub.f32 %v608_v7, %v352_v2 }
  0xc1   : > { %v611_v21 = vld [vmem:[%s2265_s29 + $0x4a0] sm:$0xff]  ;;  %v612_v23 = vld [vmem:[%s2265_s29 + $0x4a8] sm:$0xff]  ;;  %1624 = vst [vmem:[%s2293_s20 + $0x448] sm:$0xff] %v1368_v10  ;;  %1625 = vst [vmem:[%s2293_s20 + $0x450] sm:$0xff] %v1369_v11  ;;  %v1371_v24 = vadd.f32 %v1115_v12, %v347_v40  ;;  %v1372_v25 = vadd.f32 %v1116_v13, %v348_v46  ;;  %v865_v27 = vsub.f32 %v609_v9, %v353_v8  ;;  %v1118_v31 = vmul.f32 0.5, %v862_v19 }
  0xc2   : > { %v357_v28 = vld [vmem:[%s2257_s19 + $0x4b0] sm:$0xff]  ;;  %1626 = vst [vmem:[%s2293_s20 + $0x458] sm:$0xff] %v1370_v17  ;;  %v1373_v30 = vadd.f32 %v1117_v18, %v349_v52  ;;  %v1119_v32 = vmul.f32 0.5, %v863_v20  ;;  %v866_v33 = vsub.f32 %v610_v15, %v354_v14  ;;  %v358_v34 = vld [vmem:[%s2257_s19 + $0x4b8] sm:$0xff]  ;;  %v1120_v36 = vmul.f32 0.5, %v864_v26  ;;  %v359_v40 = vld [vmem:[%s2257_s19 + $0x4c0] sm:$0xff] }
  0xc3   : > { %v613_v29 = vld [vmem:[%s2265_s29 + $0x4b0] sm:$0xff]  ;;  %v614_v35 = vld [vmem:[%s2265_s29 + $0x4b8] sm:$0xff]  ;;  %1627 = vst [vmem:[%s2293_s20 + $0x460] sm:$0xff] %v1371_v24  ;;  %1628 = vst [vmem:[%s2293_s20 + $0x468] sm:$0xff] %v1372_v25  ;;  %v1121_v37 = vmul.f32 0.5, %v865_v27  ;;  %v867_v38 = vsub.f32 %v611_v21, %v355_v16  ;;  %v868_v39 = vsub.f32 %v612_v23, %v356_v22  ;;  %v1374_v43 = vadd.f32 %v1118_v31, %v350_v58 }
  0xc4   : > { %v615_v41 = vld [vmem:[%s2265_s29 + $0x4c0] sm:$0xff]  ;;  %v360_v42 = vld [vmem:[%s2257_s19 + $0x4c8] sm:$0xff]  ;;  %1629 = vst [vmem:[%s2293_s20 + $0x470] sm:$0xff] %v1373_v30  ;;  %v1375_v44 = vadd.f32 %v1119_v32, %v351_v0  ;;  %v1122_v45 = vmul.f32 0.5, %v866_v33  ;;  %v869_v46 = vsub.f32 %v613_v29, %v357_v28  ;;  %v361_v48 = vld [vmem:[%s2257_s19 + $0x4d0] sm:$0xff]  ;;  %v1376_v50 = vadd.f32 %v1120_v36, %v352_v2 }
  0xc5   : > { %v616_v47 = vld [vmem:[%s2265_s29 + $0x4c8] sm:$0xff]  ;;  %v617_v49 = vld [vmem:[%s2265_s29 + $0x4d0] sm:$0xff]  ;;  %v1377_v51 = vadd.f32 %v1121_v37, %v353_v8  ;;  %v1123_v52 = vmul.f32 0.5, %v867_v38  ;;  %v1124_v53 = vmul.f32 0.5, %v868_v39  ;;  %v362_v54 = vld [vmem:[%s2257_s19 + $0x4d8] sm:$0xff]  ;;  %1630 = vst [vmem:[%s2293_s20 + $0x478] sm:$0xff] %v1374_v43  ;;  %v870_v59 = vsub.f32 %v614_v35, %v358_v34 }
  0xc6   : > { %v618_v55 = vld [vmem:[%s2265_s29 + $0x4d8] sm:$0xff]  ;;  %v363_v56 = vld [vmem:[%s2257_s19 + $0x4e0] sm:$0xff]  ;;  %1631 = vst [vmem:[%s2293_s20 + $0x480] sm:$0xff] %v1375_v44  ;;  %v1378_v57 = vadd.f32 %v1122_v45, %v354_v14  ;;  %v1125_v58 = vmul.f32 0.5, %v869_v46  ;;  %v871_v60 = vsub.f32 %v615_v41, %v359_v40  ;;  %v364_v62 = vld [vmem:[%s2257_s19 + $0x4e8] sm:$0xff]  ;;  %v872_v2 = vsub.f32 %v616_v47, %v360_v42 }
  0xc7   : > { %v619_v61 = vld [vmem:[%s2265_s29 + $0x4e0] sm:$0xff]  ;;  %v620_v63 = vld [vmem:[%s2265_s29 + $0x4e8] sm:$0xff]  ;;  %1632 = vst [vmem:[%s2293_s20 + $0x488] sm:$0xff] %v1376_v50  ;;  %1633 = vst [vmem:[%s2293_s20 + $0x490] sm:$0xff] %v1377_v51  ;;  %v1379_v0 = vadd.f32 %v1123_v52, %v355_v16  ;;  %v1380_v1 = vadd.f32 %v1124_v53, %v356_v22  ;;  %v873_v3 = vsub.f32 %v617_v49, %v361_v48  ;;  %v1126_v7 = vmul.f32 0.5, %v870_v59 }
  0xc8   : > { %v365_v4 = vld [vmem:[%s2257_s19 + $0x4f0] sm:$0xff]  ;;  %1634 = vst [vmem:[%s2293_s20 + $0x498] sm:$0xff] %v1378_v57  ;;  %v1381_v6 = vadd.f32 %v1125_v58, %v357_v28  ;;  %v1127_v8 = vmul.f32 0.5, %v871_v60  ;;  %v874_v9 = vsub.f32 %v618_v55, %v362_v54  ;;  %v366_v10 = vld [vmem:[%s2257_s19 + $0x4f8] sm:$0xff]  ;;  %v1128_v12 = vmul.f32 0.5, %v872_v2  ;;  %v367_v16 = vld [vmem:[%s2257_s19 + $0x500] sm:$0xff] }
  0xc9   : > { %v621_v5 = vld [vmem:[%s2265_s29 + $0x4f0] sm:$0xff]  ;;  %v622_v11 = vld [vmem:[%s2265_s29 + $0x4f8] sm:$0xff]  ;;  %1635 = vst [vmem:[%s2293_s20 + $0x4a0] sm:$0xff] %v1379_v0  ;;  %1636 = vst [vmem:[%s2293_s20 + $0x4a8] sm:$0xff] %v1380_v1  ;;  %v1129_v13 = vmul.f32 0.5, %v873_v3  ;;  %v875_v14 = vsub.f32 %v619_v61, %v363_v56  ;;  %v876_v15 = vsub.f32 %v620_v63, %v364_v62  ;;  %v1382_v19 = vadd.f32 %v1126_v7, %v358_v34 }
  0xca   : > { %v623_v17 = vld [vmem:[%s2265_s29 + $0x500] sm:$0xff]  ;;  %v368_v18 = vld [vmem:[%s2257_s19 + $0x508] sm:$0xff]  ;;  %1637 = vst [vmem:[%s2293_s20 + $0x4b0] sm:$0xff] %v1381_v6  ;;  %v1383_v20 = vadd.f32 %v1127_v8, %v359_v40  ;;  %v1130_v21 = vmul.f32 0.5, %v874_v9  ;;  %v877_v22 = vsub.f32 %v621_v5, %v365_v4  ;;  %v369_v24 = vld [vmem:[%s2257_s19 + $0x510] sm:$0xff]  ;;  %v1384_v26 = vadd.f32 %v1128_v12, %v360_v42 }
  0xcb   : > { %v624_v23 = vld [vmem:[%s2265_s29 + $0x508] sm:$0xff]  ;;  %v625_v25 = vld [vmem:[%s2265_s29 + $0x510] sm:$0xff]  ;;  %v1385_v27 = vadd.f32 %v1129_v13, %v361_v48  ;;  %v1131_v28 = vmul.f32 0.5, %v875_v14  ;;  %v1132_v29 = vmul.f32 0.5, %v876_v15  ;;  %v370_v30 = vld [vmem:[%s2257_s19 + $0x518] sm:$0xff]  ;;  %1638 = vst [vmem:[%s2293_s20 + $0x4b8] sm:$0xff] %v1382_v19  ;;  %v878_v35 = vsub.f32 %v622_v11, %v366_v10 }
  0xcc   : > { %v626_v31 = vld [vmem:[%s2265_s29 + $0x518] sm:$0xff]  ;;  %v371_v32 = vld [vmem:[%s2257_s19 + $0x520] sm:$0xff]  ;;  %1639 = vst [vmem:[%s2293_s20 + $0x4c0] sm:$0xff] %v1383_v20  ;;  %v1386_v33 = vadd.f32 %v1130_v21, %v362_v54  ;;  %v1133_v34 = vmul.f32 0.5, %v877_v22  ;;  %v879_v36 = vsub.f32 %v623_v17, %v367_v16  ;;  %v372_v38 = vld [vmem:[%s2257_s19 + $0x528] sm:$0xff]  ;;  %v880_v42 = vsub.f32 %v624_v23, %v368_v18 }
  0xcd   : > { %v627_v37 = vld [vmem:[%s2265_s29 + $0x520] sm:$0xff]  ;;  %v628_v39 = vld [vmem:[%s2265_s29 + $0x528] sm:$0xff]  ;;  %1640 = vst [vmem:[%s2293_s20 + $0x4c8] sm:$0xff] %v1384_v26  ;;  %1641 = vst [vmem:[%s2293_s20 + $0x4d0] sm:$0xff] %v1385_v27  ;;  %v1387_v40 = vadd.f32 %v1131_v28, %v363_v56  ;;  %v1388_v41 = vadd.f32 %v1132_v29, %v364_v62  ;;  %v881_v43 = vsub.f32 %v625_v25, %v369_v24  ;;  %v1134_v47 = vmul.f32 0.5, %v878_v35 }
  0xce   : > { %v373_v44 = vld [vmem:[%s2257_s19 + $0x530] sm:$0xff]  ;;  %1642 = vst [vmem:[%s2293_s20 + $0x4d8] sm:$0xff] %v1386_v33  ;;  %v1389_v46 = vadd.f32 %v1133_v34, %v365_v4  ;;  %v1135_v48 = vmul.f32 0.5, %v879_v36  ;;  %v882_v49 = vsub.f32 %v626_v31, %v370_v30  ;;  %v374_v50 = vld [vmem:[%s2257_s19 + $0x538] sm:$0xff]  ;;  %v1136_v52 = vmul.f32 0.5, %v880_v42  ;;  %v375_v56 = vld [vmem:[%s2257_s19 + $0x540] sm:$0xff] }
  0xcf   : > { %v629_v45 = vld [vmem:[%s2265_s29 + $0x530] sm:$0xff]  ;;  %v630_v51 = vld [vmem:[%s2265_s29 + $0x538] sm:$0xff]  ;;  %1643 = vst [vmem:[%s2293_s20 + $0x4e0] sm:$0xff] %v1387_v40  ;;  %1644 = vst [vmem:[%s2293_s20 + $0x4e8] sm:$0xff] %v1388_v41  ;;  %v1137_v53 = vmul.f32 0.5, %v881_v43  ;;  %v883_v54 = vsub.f32 %v627_v37, %v371_v32  ;;  %v884_v55 = vsub.f32 %v628_v39, %v372_v38  ;;  %v1390_v59 = vadd.f32 %v1134_v47, %v366_v10 }
  0xd0   : > { %v631_v57 = vld [vmem:[%s2265_s29 + $0x540] sm:$0xff]  ;;  %v376_v58 = vld [vmem:[%s2257_s19 + $0x548] sm:$0xff]  ;;  %1645 = vst [vmem:[%s2293_s20 + $0x4f0] sm:$0xff] %v1389_v46  ;;  %v1391_v60 = vadd.f32 %v1135_v48, %v367_v16  ;;  %v1138_v61 = vmul.f32 0.5, %v882_v49  ;;  %v885_v62 = vsub.f32 %v629_v45, %v373_v44  ;;  %v377_v0 = vld [vmem:[%s2257_s19 + $0x550] sm:$0xff]  ;;  %v1392_v2 = vadd.f32 %v1136_v52, %v368_v18 }
  0xd1   : > { %v632_v63 = vld [vmem:[%s2265_s29 + $0x548] sm:$0xff]  ;;  %v633_v1 = vld [vmem:[%s2265_s29 + $0x550] sm:$0xff]  ;;  %v1393_v3 = vadd.f32 %v1137_v53, %v369_v24  ;;  %v1139_v4 = vmul.f32 0.5, %v883_v54  ;;  %v1140_v5 = vmul.f32 0.5, %v884_v55  ;;  %v378_v6 = vld [vmem:[%s2257_s19 + $0x558] sm:$0xff]  ;;  %1646 = vst [vmem:[%s2293_s20 + $0x4f8] sm:$0xff] %v1390_v59  ;;  %v886_v11 = vsub.f32 %v630_v51, %v374_v50 }
  0xd2   : > { %v634_v7 = vld [vmem:[%s2265_s29 + $0x558] sm:$0xff]  ;;  %v379_v8 = vld [vmem:[%s2257_s19 + $0x560] sm:$0xff]  ;;  %1647 = vst [vmem:[%s2293_s20 + $0x500] sm:$0xff] %v1391_v60  ;;  %v1394_v9 = vadd.f32 %v1138_v61, %v370_v30  ;;  %v1141_v10 = vmul.f32 0.5, %v885_v62  ;;  %v887_v12 = vsub.f32 %v631_v57, %v375_v56  ;;  %v380_v14 = vld [vmem:[%s2257_s19 + $0x568] sm:$0xff]  ;;  %v888_v18 = vsub.f32 %v632_v63, %v376_v58 }
  0xd3   : > { %v635_v13 = vld [vmem:[%s2265_s29 + $0x560] sm:$0xff]  ;;  %v636_v15 = vld [vmem:[%s2265_s29 + $0x568] sm:$0xff]  ;;  %1648 = vst [vmem:[%s2293_s20 + $0x508] sm:$0xff] %v1392_v2  ;;  %1649 = vst [vmem:[%s2293_s20 + $0x510] sm:$0xff] %v1393_v3  ;;  %v1395_v16 = vadd.f32 %v1139_v4, %v371_v32  ;;  %v1396_v17 = vadd.f32 %v1140_v5, %v372_v38  ;;  %v889_v19 = vsub.f32 %v633_v1, %v377_v0  ;;  %v1142_v23 = vmul.f32 0.5, %v886_v11 }
  0xd4   : > { %v381_v20 = vld [vmem:[%s2257_s19 + $0x570] sm:$0xff]  ;;  %1650 = vst [vmem:[%s2293_s20 + $0x518] sm:$0xff] %v1394_v9  ;;  %v1397_v22 = vadd.f32 %v1141_v10, %v373_v44  ;;  %v1143_v24 = vmul.f32 0.5, %v887_v12  ;;  %v890_v25 = vsub.f32 %v634_v7, %v378_v6  ;;  %v382_v26 = vld [vmem:[%s2257_s19 + $0x578] sm:$0xff]  ;;  %v1144_v28 = vmul.f32 0.5, %v888_v18  ;;  %v383_v32 = vld [vmem:[%s2257_s19 + $0x580] sm:$0xff] }
  0xd5   : > { %v637_v21 = vld [vmem:[%s2265_s29 + $0x570] sm:$0xff]  ;;  %v638_v27 = vld [vmem:[%s2265_s29 + $0x578] sm:$0xff]  ;;  %1651 = vst [vmem:[%s2293_s20 + $0x520] sm:$0xff] %v1395_v16  ;;  %1652 = vst [vmem:[%s2293_s20 + $0x528] sm:$0xff] %v1396_v17  ;;  %v1145_v29 = vmul.f32 0.5, %v889_v19  ;;  %v891_v30 = vsub.f32 %v635_v13, %v379_v8  ;;  %v892_v31 = vsub.f32 %v636_v15, %v380_v14  ;;  %v1398_v35 = vadd.f32 %v1142_v23, %v374_v50 }
  0xd6   : > { %v639_v33 = vld [vmem:[%s2265_s29 + $0x580] sm:$0xff]  ;;  %v384_v34 = vld [vmem:[%s2257_s19 + $0x588] sm:$0xff]  ;;  %1653 = vst [vmem:[%s2293_s20 + $0x530] sm:$0xff] %v1397_v22  ;;  %v1399_v36 = vadd.f32 %v1143_v24, %v375_v56  ;;  %v1146_v37 = vmul.f32 0.5, %v890_v25  ;;  %v893_v38 = vsub.f32 %v637_v21, %v381_v20  ;;  %v385_v40 = vld [vmem:[%s2257_s19 + $0x590] sm:$0xff]  ;;  %v1400_v42 = vadd.f32 %v1144_v28, %v376_v58 }
  0xd7   : > { %v640_v39 = vld [vmem:[%s2265_s29 + $0x588] sm:$0xff]  ;;  %v641_v41 = vld [vmem:[%s2265_s29 + $0x590] sm:$0xff]  ;;  %v1401_v43 = vadd.f32 %v1145_v29, %v377_v0  ;;  %v1147_v44 = vmul.f32 0.5, %v891_v30  ;;  %v1148_v45 = vmul.f32 0.5, %v892_v31  ;;  %v386_v46 = vld [vmem:[%s2257_s19 + $0x598] sm:$0xff]  ;;  %1654 = vst [vmem:[%s2293_s20 + $0x538] sm:$0xff] %v1398_v35  ;;  %v894_v51 = vsub.f32 %v638_v27, %v382_v26 }
  0xd8   : > { %v642_v47 = vld [vmem:[%s2265_s29 + $0x598] sm:$0xff]  ;;  %v387_v48 = vld [vmem:[%s2257_s19 + $0x5a0] sm:$0xff]  ;;  %1655 = vst [vmem:[%s2293_s20 + $0x540] sm:$0xff] %v1399_v36  ;;  %v1402_v49 = vadd.f32 %v1146_v37, %v378_v6  ;;  %v1149_v50 = vmul.f32 0.5, %v893_v38  ;;  %v895_v52 = vsub.f32 %v639_v33, %v383_v32  ;;  %v388_v54 = vld [vmem:[%s2257_s19 + $0x5a8] sm:$0xff]  ;;  %v896_v58 = vsub.f32 %v640_v39, %v384_v34 }
  0xd9   : > { %v643_v53 = vld [vmem:[%s2265_s29 + $0x5a0] sm:$0xff]  ;;  %v644_v55 = vld [vmem:[%s2265_s29 + $0x5a8] sm:$0xff]  ;;  %1656 = vst [vmem:[%s2293_s20 + $0x548] sm:$0xff] %v1400_v42  ;;  %1657 = vst [vmem:[%s2293_s20 + $0x550] sm:$0xff] %v1401_v43  ;;  %v1403_v56 = vadd.f32 %v1147_v44, %v379_v8  ;;  %v1404_v57 = vadd.f32 %v1148_v45, %v380_v14  ;;  %v897_v59 = vsub.f32 %v641_v41, %v385_v40  ;;  %v1150_v63 = vmul.f32 0.5, %v894_v51 }
  0xda   : > { %v389_v60 = vld [vmem:[%s2257_s19 + $0x5b0] sm:$0xff]  ;;  %1658 = vst [vmem:[%s2293_s20 + $0x558] sm:$0xff] %v1402_v49  ;;  %v1405_v62 = vadd.f32 %v1149_v50, %v381_v20  ;;  %v1151_v0 = vmul.f32 0.5, %v895_v52  ;;  %v898_v1 = vsub.f32 %v642_v47, %v386_v46  ;;  %v390_v2 = vld [vmem:[%s2257_s19 + $0x5b8] sm:$0xff]  ;;  %v1152_v4 = vmul.f32 0.5, %v896_v58  ;;  %v391_v8 = vld [vmem:[%s2257_s19 + $0x5c0] sm:$0xff] }
  0xdb   : > { %v645_v61 = vld [vmem:[%s2265_s29 + $0x5b0] sm:$0xff]  ;;  %v646_v3 = vld [vmem:[%s2265_s29 + $0x5b8] sm:$0xff]  ;;  %1659 = vst [vmem:[%s2293_s20 + $0x560] sm:$0xff] %v1403_v56  ;;  %1660 = vst [vmem:[%s2293_s20 + $0x568] sm:$0xff] %v1404_v57  ;;  %v1153_v5 = vmul.f32 0.5, %v897_v59  ;;  %v899_v6 = vsub.f32 %v643_v53, %v387_v48  ;;  %v900_v7 = vsub.f32 %v644_v55, %v388_v54  ;;  %v1406_v11 = vadd.f32 %v1150_v63, %v382_v26 }
  0xdc   : > { %v647_v9 = vld [vmem:[%s2265_s29 + $0x5c0] sm:$0xff]  ;;  %v392_v10 = vld [vmem:[%s2257_s19 + $0x5c8] sm:$0xff]  ;;  %1661 = vst [vmem:[%s2293_s20 + $0x570] sm:$0xff] %v1405_v62  ;;  %v1407_v12 = vadd.f32 %v1151_v0, %v383_v32  ;;  %v1154_v13 = vmul.f32 0.5, %v898_v1  ;;  %v901_v14 = vsub.f32 %v645_v61, %v389_v60  ;;  %v393_v16 = vld [vmem:[%s2257_s19 + $0x5d0] sm:$0xff]  ;;  %v1408_v18 = vadd.f32 %v1152_v4, %v384_v34 }
  0xdd   : > { %v648_v15 = vld [vmem:[%s2265_s29 + $0x5c8] sm:$0xff]  ;;  %v649_v17 = vld [vmem:[%s2265_s29 + $0x5d0] sm:$0xff]  ;;  %v1409_v19 = vadd.f32 %v1153_v5, %v385_v40  ;;  %v1155_v20 = vmul.f32 0.5, %v899_v6  ;;  %v1156_v21 = vmul.f32 0.5, %v900_v7  ;;  %v394_v22 = vld [vmem:[%s2257_s19 + $0x5d8] sm:$0xff]  ;;  %1662 = vst [vmem:[%s2293_s20 + $0x578] sm:$0xff] %v1406_v11  ;;  %v902_v27 = vsub.f32 %v646_v3, %v390_v2 }
  0xde   : > { %v650_v23 = vld [vmem:[%s2265_s29 + $0x5d8] sm:$0xff]  ;;  %v395_v24 = vld [vmem:[%s2257_s19 + $0x5e0] sm:$0xff]  ;;  %1663 = vst [vmem:[%s2293_s20 + $0x580] sm:$0xff] %v1407_v12  ;;  %v1410_v25 = vadd.f32 %v1154_v13, %v386_v46  ;;  %v1157_v26 = vmul.f32 0.5, %v901_v14  ;;  %v903_v28 = vsub.f32 %v647_v9, %v391_v8  ;;  %v396_v30 = vld [vmem:[%s2257_s19 + $0x5e8] sm:$0xff]  ;;  %v904_v34 = vsub.f32 %v648_v15, %v392_v10 }
  0xdf   : > { %v651_v29 = vld [vmem:[%s2265_s29 + $0x5e0] sm:$0xff]  ;;  %v652_v31 = vld [vmem:[%s2265_s29 + $0x5e8] sm:$0xff]  ;;  %1664 = vst [vmem:[%s2293_s20 + $0x588] sm:$0xff] %v1408_v18  ;;  %1665 = vst [vmem:[%s2293_s20 + $0x590] sm:$0xff] %v1409_v19  ;;  %v1411_v32 = vadd.f32 %v1155_v20, %v387_v48  ;;  %v1412_v33 = vadd.f32 %v1156_v21, %v388_v54  ;;  %v905_v35 = vsub.f32 %v649_v17, %v393_v16  ;;  %v1158_v39 = vmul.f32 0.5, %v902_v27 }
  0xe0   : > { %v397_v36 = vld [vmem:[%s2257_s19 + $0x5f0] sm:$0xff]  ;;  %1666 = vst [vmem:[%s2293_s20 + $0x598] sm:$0xff] %v1410_v25  ;;  %v1413_v38 = vadd.f32 %v1157_v26, %v389_v60  ;;  %v1159_v40 = vmul.f32 0.5, %v903_v28  ;;  %v906_v41 = vsub.f32 %v650_v23, %v394_v22  ;;  %v398_v42 = vld [vmem:[%s2257_s19 + $0x5f8] sm:$0xff]  ;;  %v1160_v44 = vmul.f32 0.5, %v904_v34  ;;  %v399_v48 = vld [vmem:[%s2257_s19 + $0x600] sm:$0xff] }
  0xe1   : > { %v653_v37 = vld [vmem:[%s2265_s29 + $0x5f0] sm:$0xff]  ;;  %v654_v43 = vld [vmem:[%s2265_s29 + $0x5f8] sm:$0xff]  ;;  %1667 = vst [vmem:[%s2293_s20 + $0x5a0] sm:$0xff] %v1411_v32  ;;  %1668 = vst [vmem:[%s2293_s20 + $0x5a8] sm:$0xff] %v1412_v33  ;;  %v1161_v45 = vmul.f32 0.5, %v905_v35  ;;  %v907_v46 = vsub.f32 %v651_v29, %v395_v24  ;;  %v908_v47 = vsub.f32 %v652_v31, %v396_v30  ;;  %v1414_v51 = vadd.f32 %v1158_v39, %v390_v2 }
  0xe2   : > { %v655_v49 = vld [vmem:[%s2265_s29 + $0x600] sm:$0xff]  ;;  %v400_v50 = vld [vmem:[%s2257_s19 + $0x608] sm:$0xff]  ;;  %1669 = vst [vmem:[%s2293_s20 + $0x5b0] sm:$0xff] %v1413_v38  ;;  %v1415_v52 = vadd.f32 %v1159_v40, %v391_v8  ;;  %v1162_v53 = vmul.f32 0.5, %v906_v41  ;;  %v909_v54 = vsub.f32 %v653_v37, %v397_v36  ;;  %v401_v56 = vld [vmem:[%s2257_s19 + $0x610] sm:$0xff]  ;;  %v1416_v58 = vadd.f32 %v1160_v44, %v392_v10 }
  0xe3   : > { %v656_v55 = vld [vmem:[%s2265_s29 + $0x608] sm:$0xff]  ;;  %v657_v57 = vld [vmem:[%s2265_s29 + $0x610] sm:$0xff]  ;;  %v1417_v59 = vadd.f32 %v1161_v45, %v393_v16  ;;  %v1163_v60 = vmul.f32 0.5, %v907_v46  ;;  %v1164_v61 = vmul.f32 0.5, %v908_v47  ;;  %v402_v62 = vld [vmem:[%s2257_s19 + $0x618] sm:$0xff]  ;;  %1670 = vst [vmem:[%s2293_s20 + $0x5b8] sm:$0xff] %v1414_v51  ;;  %v910_v3 = vsub.f32 %v654_v43, %v398_v42 }
  0xe4   : > { %v658_v63 = vld [vmem:[%s2265_s29 + $0x618] sm:$0xff]  ;;  %v403_v0 = vld [vmem:[%s2257_s19 + $0x620] sm:$0xff]  ;;  %1671 = vst [vmem:[%s2293_s20 + $0x5c0] sm:$0xff] %v1415_v52  ;;  %v1418_v1 = vadd.f32 %v1162_v53, %v394_v22  ;;  %v1165_v2 = vmul.f32 0.5, %v909_v54  ;;  %v911_v4 = vsub.f32 %v655_v49, %v399_v48  ;;  %v404_v6 = vld [vmem:[%s2257_s19 + $0x628] sm:$0xff]  ;;  %v912_v10 = vsub.f32 %v656_v55, %v400_v50 }
  0xe5   : > { %v659_v5 = vld [vmem:[%s2265_s29 + $0x620] sm:$0xff]  ;;  %v660_v7 = vld [vmem:[%s2265_s29 + $0x628] sm:$0xff]  ;;  %1672 = vst [vmem:[%s2293_s20 + $0x5c8] sm:$0xff] %v1416_v58  ;;  %1673 = vst [vmem:[%s2293_s20 + $0x5d0] sm:$0xff] %v1417_v59  ;;  %v1419_v8 = vadd.f32 %v1163_v60, %v395_v24  ;;  %v1420_v9 = vadd.f32 %v1164_v61, %v396_v30  ;;  %v913_v11 = vsub.f32 %v657_v57, %v401_v56  ;;  %v1166_v15 = vmul.f32 0.5, %v910_v3 }
  0xe6   : > { %v405_v12 = vld [vmem:[%s2257_s19 + $0x630] sm:$0xff]  ;;  %1674 = vst [vmem:[%s2293_s20 + $0x5d8] sm:$0xff] %v1418_v1  ;;  %v1421_v14 = vadd.f32 %v1165_v2, %v397_v36  ;;  %v1167_v16 = vmul.f32 0.5, %v911_v4  ;;  %v914_v17 = vsub.f32 %v658_v63, %v402_v62  ;;  %v406_v18 = vld [vmem:[%s2257_s19 + $0x638] sm:$0xff]  ;;  %v1168_v20 = vmul.f32 0.5, %v912_v10  ;;  %v407_v24 = vld [vmem:[%s2257_s19 + $0x640] sm:$0xff] }
  0xe7   : > { %v661_v13 = vld [vmem:[%s2265_s29 + $0x630] sm:$0xff]  ;;  %v662_v19 = vld [vmem:[%s2265_s29 + $0x638] sm:$0xff]  ;;  %1675 = vst [vmem:[%s2293_s20 + $0x5e0] sm:$0xff] %v1419_v8  ;;  %1676 = vst [vmem:[%s2293_s20 + $0x5e8] sm:$0xff] %v1420_v9  ;;  %v1169_v21 = vmul.f32 0.5, %v913_v11  ;;  %v915_v22 = vsub.f32 %v659_v5, %v403_v0  ;;  %v916_v23 = vsub.f32 %v660_v7, %v404_v6  ;;  %v1422_v27 = vadd.f32 %v1166_v15, %v398_v42 }
  0xe8   : > { %v663_v25 = vld [vmem:[%s2265_s29 + $0x640] sm:$0xff]  ;;  %v408_v26 = vld [vmem:[%s2257_s19 + $0x648] sm:$0xff]  ;;  %1677 = vst [vmem:[%s2293_s20 + $0x5f0] sm:$0xff] %v1421_v14  ;;  %v1423_v28 = vadd.f32 %v1167_v16, %v399_v48  ;;  %v1170_v29 = vmul.f32 0.5, %v914_v17  ;;  %v917_v30 = vsub.f32 %v661_v13, %v405_v12  ;;  %v409_v32 = vld [vmem:[%s2257_s19 + $0x650] sm:$0xff]  ;;  %v1424_v34 = vadd.f32 %v1168_v20, %v400_v50 }
  0xe9   : > { %v664_v31 = vld [vmem:[%s2265_s29 + $0x648] sm:$0xff]  ;;  %v665_v33 = vld [vmem:[%s2265_s29 + $0x650] sm:$0xff]  ;;  %v1425_v35 = vadd.f32 %v1169_v21, %v401_v56  ;;  %v1171_v36 = vmul.f32 0.5, %v915_v22  ;;  %v1172_v37 = vmul.f32 0.5, %v916_v23  ;;  %v410_v38 = vld [vmem:[%s2257_s19 + $0x658] sm:$0xff]  ;;  %1678 = vst [vmem:[%s2293_s20 + $0x5f8] sm:$0xff] %v1422_v27  ;;  %v918_v43 = vsub.f32 %v662_v19, %v406_v18 }
  0xea   : > { %v666_v39 = vld [vmem:[%s2265_s29 + $0x658] sm:$0xff]  ;;  %v411_v40 = vld [vmem:[%s2257_s19 + $0x660] sm:$0xff]  ;;  %1679 = vst [vmem:[%s2293_s20 + $0x600] sm:$0xff] %v1423_v28  ;;  %v1426_v41 = vadd.f32 %v1170_v29, %v402_v62  ;;  %v1173_v42 = vmul.f32 0.5, %v917_v30  ;;  %v919_v44 = vsub.f32 %v663_v25, %v407_v24  ;;  %v412_v46 = vld [vmem:[%s2257_s19 + $0x668] sm:$0xff]  ;;  %v920_v50 = vsub.f32 %v664_v31, %v408_v26 }
  0xeb   : > { %v667_v45 = vld [vmem:[%s2265_s29 + $0x660] sm:$0xff]  ;;  %v668_v47 = vld [vmem:[%s2265_s29 + $0x668] sm:$0xff]  ;;  %1680 = vst [vmem:[%s2293_s20 + $0x608] sm:$0xff] %v1424_v34  ;;  %1681 = vst [vmem:[%s2293_s20 + $0x610] sm:$0xff] %v1425_v35  ;;  %v1427_v48 = vadd.f32 %v1171_v36, %v403_v0  ;;  %v1428_v49 = vadd.f32 %v1172_v37, %v404_v6  ;;  %v921_v51 = vsub.f32 %v665_v33, %v409_v32  ;;  %v1174_v55 = vmul.f32 0.5, %v918_v43 }
  0xec   : > { %v413_v52 = vld [vmem:[%s2257_s19 + $0x670] sm:$0xff]  ;;  %1682 = vst [vmem:[%s2293_s20 + $0x618] sm:$0xff] %v1426_v41  ;;  %v1429_v54 = vadd.f32 %v1173_v42, %v405_v12  ;;  %v1175_v56 = vmul.f32 0.5, %v919_v44  ;;  %v922_v57 = vsub.f32 %v666_v39, %v410_v38  ;;  %v414_v58 = vld [vmem:[%s2257_s19 + $0x678] sm:$0xff]  ;;  %v1176_v60 = vmul.f32 0.5, %v920_v50  ;;  %v415_v0 = vld [vmem:[%s2257_s19 + $0x680] sm:$0xff] }
  0xed   : > { %v669_v53 = vld [vmem:[%s2265_s29 + $0x670] sm:$0xff]  ;;  %v670_v59 = vld [vmem:[%s2265_s29 + $0x678] sm:$0xff]  ;;  %1683 = vst [vmem:[%s2293_s20 + $0x620] sm:$0xff] %v1427_v48  ;;  %1684 = vst [vmem:[%s2293_s20 + $0x628] sm:$0xff] %v1428_v49  ;;  %v1177_v61 = vmul.f32 0.5, %v921_v51  ;;  %v923_v62 = vsub.f32 %v667_v45, %v411_v40  ;;  %v924_v63 = vsub.f32 %v668_v47, %v412_v46  ;;  %v1430_v3 = vadd.f32 %v1174_v55, %v406_v18 }
  0xee   : > { %v671_v1 = vld [vmem:[%s2265_s29 + $0x680] sm:$0xff]  ;;  %v416_v2 = vld [vmem:[%s2257_s19 + $0x688] sm:$0xff]  ;;  %1685 = vst [vmem:[%s2293_s20 + $0x630] sm:$0xff] %v1429_v54  ;;  %v1431_v4 = vadd.f32 %v1175_v56, %v407_v24  ;;  %v1178_v5 = vmul.f32 0.5, %v922_v57  ;;  %v925_v6 = vsub.f32 %v669_v53, %v413_v52  ;;  %v417_v8 = vld [vmem:[%s2257_s19 + $0x690] sm:$0xff]  ;;  %v1432_v10 = vadd.f32 %v1176_v60, %v408_v26 }
  0xef   : > { %v672_v7 = vld [vmem:[%s2265_s29 + $0x688] sm:$0xff]  ;;  %v673_v9 = vld [vmem:[%s2265_s29 + $0x690] sm:$0xff]  ;;  %v1433_v11 = vadd.f32 %v1177_v61, %v409_v32  ;;  %v1179_v12 = vmul.f32 0.5, %v923_v62  ;;  %v1180_v13 = vmul.f32 0.5, %v924_v63  ;;  %v418_v14 = vld [vmem:[%s2257_s19 + $0x698] sm:$0xff]  ;;  %1686 = vst [vmem:[%s2293_s20 + $0x638] sm:$0xff] %v1430_v3  ;;  %v926_v19 = vsub.f32 %v670_v59, %v414_v58 }
  0xf0   : > { %v674_v15 = vld [vmem:[%s2265_s29 + $0x698] sm:$0xff]  ;;  %v419_v16 = vld [vmem:[%s2257_s19 + $0x6a0] sm:$0xff]  ;;  %1687 = vst [vmem:[%s2293_s20 + $0x640] sm:$0xff] %v1431_v4  ;;  %v1434_v17 = vadd.f32 %v1178_v5, %v410_v38  ;;  %v1181_v18 = vmul.f32 0.5, %v925_v6  ;;  %v927_v20 = vsub.f32 %v671_v1, %v415_v0  ;;  %v420_v22 = vld [vmem:[%s2257_s19 + $0x6a8] sm:$0xff]  ;;  %v928_v26 = vsub.f32 %v672_v7, %v416_v2 }
  0xf1   : > { %v675_v21 = vld [vmem:[%s2265_s29 + $0x6a0] sm:$0xff]  ;;  %v676_v23 = vld [vmem:[%s2265_s29 + $0x6a8] sm:$0xff]  ;;  %1688 = vst [vmem:[%s2293_s20 + $0x648] sm:$0xff] %v1432_v10  ;;  %1689 = vst [vmem:[%s2293_s20 + $0x650] sm:$0xff] %v1433_v11  ;;  %v1435_v24 = vadd.f32 %v1179_v12, %v411_v40  ;;  %v1436_v25 = vadd.f32 %v1180_v13, %v412_v46  ;;  %v929_v27 = vsub.f32 %v673_v9, %v417_v8  ;;  %v1182_v31 = vmul.f32 0.5, %v926_v19 }
  0xf2   : > { %v421_v28 = vld [vmem:[%s2257_s19 + $0x6b0] sm:$0xff]  ;;  %1690 = vst [vmem:[%s2293_s20 + $0x658] sm:$0xff] %v1434_v17  ;;  %v1437_v30 = vadd.f32 %v1181_v18, %v413_v52  ;;  %v1183_v32 = vmul.f32 0.5, %v927_v20  ;;  %v930_v33 = vsub.f32 %v674_v15, %v418_v14  ;;  %v422_v34 = vld [vmem:[%s2257_s19 + $0x6b8] sm:$0xff]  ;;  %v1184_v36 = vmul.f32 0.5, %v928_v26  ;;  %v423_v40 = vld [vmem:[%s2257_s19 + $0x6c0] sm:$0xff] }
  0xf3   : > { %v677_v29 = vld [vmem:[%s2265_s29 + $0x6b0] sm:$0xff]  ;;  %v678_v35 = vld [vmem:[%s2265_s29 + $0x6b8] sm:$0xff]  ;;  %1691 = vst [vmem:[%s2293_s20 + $0x660] sm:$0xff] %v1435_v24  ;;  %1692 = vst [vmem:[%s2293_s20 + $0x668] sm:$0xff] %v1436_v25  ;;  %v1185_v37 = vmul.f32 0.5, %v929_v27  ;;  %v931_v38 = vsub.f32 %v675_v21, %v419_v16  ;;  %v932_v39 = vsub.f32 %v676_v23, %v420_v22  ;;  %v1438_v43 = vadd.f32 %v1182_v31, %v414_v58 }
  0xf4   : > { %v679_v41 = vld [vmem:[%s2265_s29 + $0x6c0] sm:$0xff]  ;;  %v424_v42 = vld [vmem:[%s2257_s19 + $0x6c8] sm:$0xff]  ;;  %1693 = vst [vmem:[%s2293_s20 + $0x670] sm:$0xff] %v1437_v30  ;;  %v1439_v44 = vadd.f32 %v1183_v32, %v415_v0  ;;  %v1186_v45 = vmul.f32 0.5, %v930_v33  ;;  %v933_v46 = vsub.f32 %v677_v29, %v421_v28  ;;  %v425_v48 = vld [vmem:[%s2257_s19 + $0x6d0] sm:$0xff]  ;;  %v1440_v50 = vadd.f32 %v1184_v36, %v416_v2 }
  0xf5   : > { %v680_v47 = vld [vmem:[%s2265_s29 + $0x6c8] sm:$0xff]  ;;  %v681_v49 = vld [vmem:[%s2265_s29 + $0x6d0] sm:$0xff]  ;;  %v1441_v51 = vadd.f32 %v1185_v37, %v417_v8  ;;  %v1187_v52 = vmul.f32 0.5, %v931_v38  ;;  %v1188_v53 = vmul.f32 0.5, %v932_v39  ;;  %v426_v54 = vld [vmem:[%s2257_s19 + $0x6d8] sm:$0xff]  ;;  %1694 = vst [vmem:[%s2293_s20 + $0x678] sm:$0xff] %v1438_v43  ;;  %v934_v59 = vsub.f32 %v678_v35, %v422_v34 }
  0xf6   : > { %v682_v55 = vld [vmem:[%s2265_s29 + $0x6d8] sm:$0xff]  ;;  %v427_v56 = vld [vmem:[%s2257_s19 + $0x6e0] sm:$0xff]  ;;  %1695 = vst [vmem:[%s2293_s20 + $0x680] sm:$0xff] %v1439_v44  ;;  %v1442_v57 = vadd.f32 %v1186_v45, %v418_v14  ;;  %v1189_v58 = vmul.f32 0.5, %v933_v46  ;;  %v935_v60 = vsub.f32 %v679_v41, %v423_v40  ;;  %v428_v62 = vld [vmem:[%s2257_s19 + $0x6e8] sm:$0xff]  ;;  %v936_v2 = vsub.f32 %v680_v47, %v424_v42 }
  0xf7   : > { %v683_v61 = vld [vmem:[%s2265_s29 + $0x6e0] sm:$0xff]  ;;  %v684_v63 = vld [vmem:[%s2265_s29 + $0x6e8] sm:$0xff]  ;;  %1696 = vst [vmem:[%s2293_s20 + $0x688] sm:$0xff] %v1440_v50  ;;  %1697 = vst [vmem:[%s2293_s20 + $0x690] sm:$0xff] %v1441_v51  ;;  %v1443_v0 = vadd.f32 %v1187_v52, %v419_v16  ;;  %v1444_v1 = vadd.f32 %v1188_v53, %v420_v22  ;;  %v937_v3 = vsub.f32 %v681_v49, %v425_v48  ;;  %v1190_v7 = vmul.f32 0.5, %v934_v59 }
  0xf8   : > { %v429_v4 = vld [vmem:[%s2257_s19 + $0x6f0] sm:$0xff]  ;;  %1698 = vst [vmem:[%s2293_s20 + $0x698] sm:$0xff] %v1442_v57  ;;  %v1445_v6 = vadd.f32 %v1189_v58, %v421_v28  ;;  %v1191_v8 = vmul.f32 0.5, %v935_v60  ;;  %v938_v9 = vsub.f32 %v682_v55, %v426_v54  ;;  %v430_v10 = vld [vmem:[%s2257_s19 + $0x6f8] sm:$0xff]  ;;  %v1192_v12 = vmul.f32 0.5, %v936_v2  ;;  %v431_v16 = vld [vmem:[%s2257_s19 + $0x700] sm:$0xff] }
  0xf9   : > { %v685_v5 = vld [vmem:[%s2265_s29 + $0x6f0] sm:$0xff]  ;;  %v686_v11 = vld [vmem:[%s2265_s29 + $0x6f8] sm:$0xff]  ;;  %1699 = vst [vmem:[%s2293_s20 + $0x6a0] sm:$0xff] %v1443_v0  ;;  %1700 = vst [vmem:[%s2293_s20 + $0x6a8] sm:$0xff] %v1444_v1  ;;  %v1193_v13 = vmul.f32 0.5, %v937_v3  ;;  %v939_v14 = vsub.f32 %v683_v61, %v427_v56  ;;  %v940_v15 = vsub.f32 %v684_v63, %v428_v62  ;;  %v1446_v19 = vadd.f32 %v1190_v7, %v422_v34 }
  0xfa   : > { %v687_v17 = vld [vmem:[%s2265_s29 + $0x700] sm:$0xff]  ;;  %v432_v18 = vld [vmem:[%s2257_s19 + $0x708] sm:$0xff]  ;;  %1701 = vst [vmem:[%s2293_s20 + $0x6b0] sm:$0xff] %v1445_v6  ;;  %v1447_v20 = vadd.f32 %v1191_v8, %v423_v40  ;;  %v1194_v21 = vmul.f32 0.5, %v938_v9  ;;  %v941_v22 = vsub.f32 %v685_v5, %v429_v4  ;;  %v433_v24 = vld [vmem:[%s2257_s19 + $0x710] sm:$0xff]  ;;  %v1448_v26 = vadd.f32 %v1192_v12, %v424_v42 }
  0xfb   : > { %v688_v23 = vld [vmem:[%s2265_s29 + $0x708] sm:$0xff]  ;;  %v689_v25 = vld [vmem:[%s2265_s29 + $0x710] sm:$0xff]  ;;  %v1449_v27 = vadd.f32 %v1193_v13, %v425_v48  ;;  %v1195_v28 = vmul.f32 0.5, %v939_v14  ;;  %v1196_v29 = vmul.f32 0.5, %v940_v15  ;;  %v434_v30 = vld [vmem:[%s2257_s19 + $0x718] sm:$0xff]  ;;  %1702 = vst [vmem:[%s2293_s20 + $0x6b8] sm:$0xff] %v1446_v19  ;;  %v942_v35 = vsub.f32 %v686_v11, %v430_v10 }
  0xfc   : > { %v690_v31 = vld [vmem:[%s2265_s29 + $0x718] sm:$0xff]  ;;  %v435_v32 = vld [vmem:[%s2257_s19 + $0x720] sm:$0xff]  ;;  %1703 = vst [vmem:[%s2293_s20 + $0x6c0] sm:$0xff] %v1447_v20  ;;  %v1450_v33 = vadd.f32 %v1194_v21, %v426_v54  ;;  %v1197_v34 = vmul.f32 0.5, %v941_v22  ;;  %v943_v36 = vsub.f32 %v687_v17, %v431_v16  ;;  %v436_v38 = vld [vmem:[%s2257_s19 + $0x728] sm:$0xff]  ;;  %v944_v42 = vsub.f32 %v688_v23, %v432_v18 }
  0xfd   : > { %v691_v37 = vld [vmem:[%s2265_s29 + $0x720] sm:$0xff]  ;;  %v692_v39 = vld [vmem:[%s2265_s29 + $0x728] sm:$0xff]  ;;  %1704 = vst [vmem:[%s2293_s20 + $0x6c8] sm:$0xff] %v1448_v26  ;;  %1705 = vst [vmem:[%s2293_s20 + $0x6d0] sm:$0xff] %v1449_v27  ;;  %v1451_v40 = vadd.f32 %v1195_v28, %v427_v56  ;;  %v1452_v41 = vadd.f32 %v1196_v29, %v428_v62  ;;  %v945_v43 = vsub.f32 %v689_v25, %v433_v24  ;;  %v1198_v47 = vmul.f32 0.5, %v942_v35 }
  0xfe   : > { %v437_v44 = vld [vmem:[%s2257_s19 + $0x730] sm:$0xff]  ;;  %1706 = vst [vmem:[%s2293_s20 + $0x6d8] sm:$0xff] %v1450_v33  ;;  %v1453_v46 = vadd.f32 %v1197_v34, %v429_v4  ;;  %v1199_v48 = vmul.f32 0.5, %v943_v36  ;;  %v946_v49 = vsub.f32 %v690_v31, %v434_v30  ;;  %v438_v50 = vld [vmem:[%s2257_s19 + $0x738] sm:$0xff]  ;;  %v1200_v52 = vmul.f32 0.5, %v944_v42  ;;  %v439_v56 = vld [vmem:[%s2257_s19 + $0x740] sm:$0xff] }
  0xff   : > { %v693_v45 = vld [vmem:[%s2265_s29 + $0x730] sm:$0xff]  ;;  %v694_v51 = vld [vmem:[%s2265_s29 + $0x738] sm:$0xff]  ;;  %1707 = vst [vmem:[%s2293_s20 + $0x6e0] sm:$0xff] %v1451_v40  ;;  %1708 = vst [vmem:[%s2293_s20 + $0x6e8] sm:$0xff] %v1452_v41  ;;  %v1201_v53 = vmul.f32 0.5, %v945_v43  ;;  %v947_v54 = vsub.f32 %v691_v37, %v435_v32  ;;  %v948_v55 = vsub.f32 %v692_v39, %v436_v38  ;;  %v1454_v59 = vadd.f32 %v1198_v47, %v430_v10 }
 0x100   : > { %v695_v57 = vld [vmem:[%s2265_s29 + $0x740] sm:$0xff]  ;;  %v440_v58 = vld [vmem:[%s2257_s19 + $0x748] sm:$0xff]  ;;  %1709 = vst [vmem:[%s2293_s20 + $0x6f0] sm:$0xff] %v1453_v46  ;;  %v1455_v60 = vadd.f32 %v1199_v48, %v431_v16  ;;  %v1202_v61 = vmul.f32 0.5, %v946_v49  ;;  %v949_v62 = vsub.f32 %v693_v45, %v437_v44  ;;  %v441_v0 = vld [vmem:[%s2257_s19 + $0x750] sm:$0xff]  ;;  %v1456_v2 = vadd.f32 %v1200_v52, %v432_v18 }
 0x101   : > { %v696_v63 = vld [vmem:[%s2265_s29 + $0x748] sm:$0xff]  ;;  %v697_v1 = vld [vmem:[%s2265_s29 + $0x750] sm:$0xff]  ;;  %v1457_v3 = vadd.f32 %v1201_v53, %v433_v24  ;;  %v1203_v4 = vmul.f32 0.5, %v947_v54  ;;  %v1204_v5 = vmul.f32 0.5, %v948_v55  ;;  %v442_v6 = vld [vmem:[%s2257_s19 + $0x758] sm:$0xff]  ;;  %1710 = vst [vmem:[%s2293_s20 + $0x6f8] sm:$0xff] %v1454_v59  ;;  %v950_v11 = vsub.f32 %v694_v51, %v438_v50 }
 0x102   : > { %v698_v7 = vld [vmem:[%s2265_s29 + $0x758] sm:$0xff]  ;;  %v443_v8 = vld [vmem:[%s2257_s19 + $0x760] sm:$0xff]  ;;  %1711 = vst [vmem:[%s2293_s20 + $0x700] sm:$0xff] %v1455_v60  ;;  %v1458_v9 = vadd.f32 %v1202_v61, %v434_v30  ;;  %v1205_v10 = vmul.f32 0.5, %v949_v62  ;;  %v951_v12 = vsub.f32 %v695_v57, %v439_v56  ;;  %v444_v14 = vld [vmem:[%s2257_s19 + $0x768] sm:$0xff]  ;;  %v952_v18 = vsub.f32 %v696_v63, %v440_v58 }
 0x103   : > { %v699_v13 = vld [vmem:[%s2265_s29 + $0x760] sm:$0xff]  ;;  %v700_v15 = vld [vmem:[%s2265_s29 + $0x768] sm:$0xff]  ;;  %1712 = vst [vmem:[%s2293_s20 + $0x708] sm:$0xff] %v1456_v2  ;;  %1713 = vst [vmem:[%s2293_s20 + $0x710] sm:$0xff] %v1457_v3  ;;  %v1459_v16 = vadd.f32 %v1203_v4, %v435_v32  ;;  %v1460_v17 = vadd.f32 %v1204_v5, %v436_v38  ;;  %v953_v19 = vsub.f32 %v697_v1, %v441_v0  ;;  %v1206_v23 = vmul.f32 0.5, %v950_v11 }
 0x104   : > { %v445_v20 = vld [vmem:[%s2257_s19 + $0x770] sm:$0xff]  ;;  %1714 = vst [vmem:[%s2293_s20 + $0x718] sm:$0xff] %v1458_v9  ;;  %v1461_v22 = vadd.f32 %v1205_v10, %v437_v44  ;;  %v1207_v24 = vmul.f32 0.5, %v951_v12  ;;  %v954_v25 = vsub.f32 %v698_v7, %v442_v6  ;;  %v446_v26 = vld [vmem:[%s2257_s19 + $0x778] sm:$0xff]  ;;  %v1208_v28 = vmul.f32 0.5, %v952_v18  ;;  %v447_v32 = vld [vmem:[%s2257_s19 + $0x780] sm:$0xff] }
 0x105   : > { %v701_v21 = vld [vmem:[%s2265_s29 + $0x770] sm:$0xff]  ;;  %v702_v27 = vld [vmem:[%s2265_s29 + $0x778] sm:$0xff]  ;;  %1715 = vst [vmem:[%s2293_s20 + $0x720] sm:$0xff] %v1459_v16  ;;  %1716 = vst [vmem:[%s2293_s20 + $0x728] sm:$0xff] %v1460_v17  ;;  %v1209_v29 = vmul.f32 0.5, %v953_v19  ;;  %v955_v30 = vsub.f32 %v699_v13, %v443_v8  ;;  %v956_v31 = vsub.f32 %v700_v15, %v444_v14  ;;  %v1462_v35 = vadd.f32 %v1206_v23, %v438_v50 }
 0x106   : > { %v703_v33 = vld [vmem:[%s2265_s29 + $0x780] sm:$0xff]  ;;  %v448_v34 = vld [vmem:[%s2257_s19 + $0x788] sm:$0xff]  ;;  %1717 = vst [vmem:[%s2293_s20 + $0x730] sm:$0xff] %v1461_v22  ;;  %v1463_v36 = vadd.f32 %v1207_v24, %v439_v56  ;;  %v1210_v37 = vmul.f32 0.5, %v954_v25  ;;  %v957_v38 = vsub.f32 %v701_v21, %v445_v20  ;;  %v449_v40 = vld [vmem:[%s2257_s19 + $0x790] sm:$0xff]  ;;  %v1464_v42 = vadd.f32 %v1208_v28, %v440_v58 }
 0x107   : > { %v704_v39 = vld [vmem:[%s2265_s29 + $0x788] sm:$0xff]  ;;  %v705_v41 = vld [vmem:[%s2265_s29 + $0x790] sm:$0xff]  ;;  %v1465_v43 = vadd.f32 %v1209_v29, %v441_v0  ;;  %v1211_v44 = vmul.f32 0.5, %v955_v30  ;;  %v1212_v45 = vmul.f32 0.5, %v956_v31  ;;  %v450_v46 = vld [vmem:[%s2257_s19 + $0x798] sm:$0xff]  ;;  %1718 = vst [vmem:[%s2293_s20 + $0x738] sm:$0xff] %v1462_v35  ;;  %v958_v51 = vsub.f32 %v702_v27, %v446_v26 }
 0x108   : > { %v706_v47 = vld [vmem:[%s2265_s29 + $0x798] sm:$0xff]  ;;  %v451_v48 = vld [vmem:[%s2257_s19 + $0x7a0] sm:$0xff]  ;;  %1719 = vst [vmem:[%s2293_s20 + $0x740] sm:$0xff] %v1463_v36  ;;  %v1466_v49 = vadd.f32 %v1210_v37, %v442_v6  ;;  %v1213_v50 = vmul.f32 0.5, %v957_v38  ;;  %v959_v52 = vsub.f32 %v703_v33, %v447_v32  ;;  %v452_v54 = vld [vmem:[%s2257_s19 + $0x7a8] sm:$0xff]  ;;  %v960_v58 = vsub.f32 %v704_v39, %v448_v34 }
 0x109   : > { %v707_v53 = vld [vmem:[%s2265_s29 + $0x7a0] sm:$0xff]  ;;  %v708_v55 = vld [vmem:[%s2265_s29 + $0x7a8] sm:$0xff]  ;;  %1720 = vst [vmem:[%s2293_s20 + $0x748] sm:$0xff] %v1464_v42  ;;  %1721 = vst [vmem:[%s2293_s20 + $0x750] sm:$0xff] %v1465_v43  ;;  %v1467_v56 = vadd.f32 %v1211_v44, %v443_v8  ;;  %v1468_v57 = vadd.f32 %v1212_v45, %v444_v14  ;;  %v961_v59 = vsub.f32 %v705_v41, %v449_v40  ;;  %v1214_v63 = vmul.f32 0.5, %v958_v51 }
 0x10a   : > { %v453_v60 = vld [vmem:[%s2257_s19 + $0x7b0] sm:$0xff]  ;;  %1722 = vst [vmem:[%s2293_s20 + $0x758] sm:$0xff] %v1466_v49  ;;  %v1469_v62 = vadd.f32 %v1213_v50, %v445_v20  ;;  %v1215_v0 = vmul.f32 0.5, %v959_v52  ;;  %v962_v1 = vsub.f32 %v706_v47, %v450_v46  ;;  %v454_v2 = vld [vmem:[%s2257_s19 + $0x7b8] sm:$0xff]  ;;  %v1216_v4 = vmul.f32 0.5, %v960_v58  ;;  %v455_v8 = vld [vmem:[%s2257_s19 + $0x7c0] sm:$0xff] }
 0x10b   : > { %v709_v61 = vld [vmem:[%s2265_s29 + $0x7b0] sm:$0xff]  ;;  %v710_v3 = vld [vmem:[%s2265_s29 + $0x7b8] sm:$0xff]  ;;  %1723 = vst [vmem:[%s2293_s20 + $0x760] sm:$0xff] %v1467_v56  ;;  %1724 = vst [vmem:[%s2293_s20 + $0x768] sm:$0xff] %v1468_v57  ;;  %v1217_v5 = vmul.f32 0.5, %v961_v59  ;;  %v963_v6 = vsub.f32 %v707_v53, %v451_v48  ;;  %v964_v7 = vsub.f32 %v708_v55, %v452_v54  ;;  %v1470_v11 = vadd.f32 %v1214_v63, %v446_v26 }
 0x10c   : > { %v711_v9 = vld [vmem:[%s2265_s29 + $0x7c0] sm:$0xff]  ;;  %v456_v10 = vld [vmem:[%s2257_s19 + $0x7c8] sm:$0xff]  ;;  %1725 = vst [vmem:[%s2293_s20 + $0x770] sm:$0xff] %v1469_v62  ;;  %v1471_v12 = vadd.f32 %v1215_v0, %v447_v32  ;;  %v1218_v13 = vmul.f32 0.5, %v962_v1  ;;  %v965_v14 = vsub.f32 %v709_v61, %v453_v60  ;;  %v457_v16 = vld [vmem:[%s2257_s19 + $0x7d0] sm:$0xff]  ;;  %v1472_v18 = vadd.f32 %v1216_v4, %v448_v34 }
 0x10d   : > { %v712_v15 = vld [vmem:[%s2265_s29 + $0x7c8] sm:$0xff]  ;;  %v713_v17 = vld [vmem:[%s2265_s29 + $0x7d0] sm:$0xff]  ;;  %v1473_v19 = vadd.f32 %v1217_v5, %v449_v40  ;;  %v1219_v20 = vmul.f32 0.5, %v963_v6  ;;  %v1220_v21 = vmul.f32 0.5, %v964_v7  ;;  %v458_v22 = vld [vmem:[%s2257_s19 + $0x7d8] sm:$0xff]  ;;  %1726 = vst [vmem:[%s2293_s20 + $0x778] sm:$0xff] %v1470_v11  ;;  %v966_v27 = vsub.f32 %v710_v3, %v454_v2 }
 0x10e   : > { %v714_v23 = vld [vmem:[%s2265_s29 + $0x7d8] sm:$0xff]  ;;  %v459_v24 = vld [vmem:[%s2257_s19 + $0x7e0] sm:$0xff]  ;;  %1727 = vst [vmem:[%s2293_s20 + $0x780] sm:$0xff] %v1471_v12  ;;  %v1474_v25 = vadd.f32 %v1218_v13, %v450_v46  ;;  %v1221_v26 = vmul.f32 0.5, %v965_v14  ;;  %v967_v28 = vsub.f32 %v711_v9, %v455_v8  ;;  %v460_v30 = vld [vmem:[%s2257_s19 + $0x7e8] sm:$0xff]  ;;  %v968_v34 = vsub.f32 %v712_v15, %v456_v10 }
 0x10f   : > { %v715_v29 = vld [vmem:[%s2265_s29 + $0x7e0] sm:$0xff]  ;;  %v716_v31 = vld [vmem:[%s2265_s29 + $0x7e8] sm:$0xff]  ;;  %1728 = vst [vmem:[%s2293_s20 + $0x788] sm:$0xff] %v1472_v18  ;;  %1729 = vst [vmem:[%s2293_s20 + $0x790] sm:$0xff] %v1473_v19  ;;  %v1475_v32 = vadd.f32 %v1219_v20, %v451_v48  ;;  %v1476_v33 = vadd.f32 %v1220_v21, %v452_v54  ;;  %v969_v35 = vsub.f32 %v713_v17, %v457_v16  ;;  %v1222_v39 = vmul.f32 0.5, %v966_v27 }
 0x110   : > { %v461_v36 = vld [vmem:[%s2257_s19 + $0x7f0] sm:$0xff]  ;;  %1730 = vst [vmem:[%s2293_s20 + $0x798] sm:$0xff] %v1474_v25  ;;  %v1477_v38 = vadd.f32 %v1221_v26, %v453_v60  ;;  %v1223_v40 = vmul.f32 0.5, %v967_v28  ;;  %v970_v41 = vsub.f32 %v714_v23, %v458_v22  ;;  %v1224_v42 = vmul.f32 0.5, %v968_v34  ;;  %v462_v46 = vld [vmem:[%s2257_s19 + $0x7f8] sm:$0xff] }
 0x111   : > { %v717_v37 = vld [vmem:[%s2265_s29 + $0x7f0] sm:$0xff]  ;;  %1731 = vst [vmem:[%s2293_s20 + $0x7a0] sm:$0xff] %v1475_v32  ;;  %1732 = vst [vmem:[%s2293_s20 + $0x7a8] sm:$0xff] %v1476_v33  ;;  %v1225_v43 = vmul.f32 0.5, %v969_v35  ;;  %v971_v44 = vsub.f32 %v715_v29, %v459_v24  ;;  %v972_v45 = vsub.f32 %v716_v31, %v460_v30  ;;  %v718_v47 = vld [vmem:[%s2265_s29 + $0x7f8] sm:$0xff]  ;;  %v1478_v48 = vadd.f32 %v1222_v39, %v454_v2 }
 0x112   : > { %1733 = vst [vmem:[%s2293_s20 + $0x7b0] sm:$0xff] %v1477_v38  ;;  %v1479_v49 = vadd.f32 %v1223_v40, %v455_v8  ;;  %v1226_v50 = vmul.f32 0.5, %v970_v41  ;;  %v973_v51 = vsub.f32 %v717_v37, %v461_v36  ;;  %v1480_v52 = vadd.f32 %v1224_v42, %v456_v10 }
 0x113   : > { %v1481_v53 = vadd.f32 %v1225_v43, %v457_v16  ;;  %v1227_v54 = vmul.f32 0.5, %v971_v44  ;;  %v1228_v55 = vmul.f32 0.5, %v972_v45  ;;  %1734 = vst [vmem:[%s2293_s20 + $0x7b8] sm:$0xff] %v1478_v48  ;;  %v974_v58 = vsub.f32 %v718_v47, %v462_v46 }
 0x114   : > { %1735 = vst [vmem:[%s2293_s20 + $0x7c0] sm:$0xff] %v1479_v49  ;;  %v1482_v56 = vadd.f32 %v1226_v50, %v458_v22  ;;  %v1229_v57 = vmul.f32 0.5, %v973_v51  ;;  %1736 = vst [vmem:[%s2293_s20 + $0x7c8] sm:$0xff] %v1480_v52 }
 0x115   : > { %1737 = vst [vmem:[%s2293_s20 + $0x7d0] sm:$0xff] %v1481_v53  ;;  %v1483_v59 = vadd.f32 %v1227_v54, %v459_v24  ;;  %v1484_v60 = vadd.f32 %v1228_v55, %v460_v30  ;;  %v1230_v62 = vmul.f32 0.5, %v974_v58 }
 0x116   : > { %1738 = vst [vmem:[%s2293_s20 + $0x7d8] sm:$0xff] %v1482_v56  ;;  %v1485_v61 = vadd.f32 %v1229_v57, %v461_v36 }
 0x117   : > { %1739 = vst [vmem:[%s2293_s20 + $0x7e0] sm:$0xff] %v1483_v59  ;;  %1740 = vst [vmem:[%s2293_s20 + $0x7e8] sm:$0xff] %v1484_v60  ;;  %v1486_v63 = vadd.f32 %v1230_v62, %v462_v46 }
 0x118   : > { %1741 = vst [vmem:[%s2293_s20 + $0x7f0] sm:$0xff] %v1485_v61 }
 0x119   : > { %1742 = vst [vmem:[%s2293_s20 + $0x7f8] sm:$0xff] %v1486_v63 }
 0x11a   : > { %2009 = shalt.err (!%p2006_p11)
}
 0x11b   : > { %s2010_s7 = scalar_lea.hbm %s3045_s28, 32768  ;;  %s2014_s4 = scalar_lea.hbm %s3095_s2, 65536 }
 0x11c   : > { %p2011_p3 = scmp.ne.s32.totalorder %s3045_s28, %s2010_s7  ;;  %p2015_p2 = scmp.lt.u32.totalorder %s3045_s28, %s3095_s2 }
 0x11d   : > { %p2016_p4 = scmp.lt.u32.totalorder %s2014_s4, %s2010_s7  ;;  %p2018_p13 = scmp.lt.u32.totalorder %s2010_s7, %s3045_s28 }
 0x11e   : > { %p2012_p8 = pnand %p2011_p3, %p3105_p1 }
 0x11f   : > { %p2017_p6 = por %p2016_p4, %p2015_p2 }
 0x120   : > { %p2013_p0 = pneg %p2012_p8 }
 0x121   : > { %p2019_p12 = por %p2018_p13, %p2017_p6 }
 0x123   : > { %p2020_p10 = pnand %p2019_p12, %p2013_p0 }
 0x125   : > { %2023 = shalt.err (!%p2020_p10)
}
 0x126   : > { %s2073_s23 = smov 4096   ;;  %s2074_s29 = smov 256  }
 0x127   : > { %1885 = dma.vmem_to_hbm [thread:$0]  (%p3105_p1), %s3047_s6, 32768, %s3045_s28, %s1744_s13, %s2073_s23, %s2073_s23, %s2074_s29  }
 0x128 PF: > { %s1773_s20 = sand.u32 1, %s2054_s9   ;;  %p3106_p5 = scmp.ne.s32.totalorder %s3101_s22, 0 }
 0x129   : > { %p3107_p7 = scmp.ge.s32.totalorder %s2066_s12, 2  ;;  %s1774_s5 = scalar_lea.sflag [#allocation4], %s1773_s20 }
 0x12b   : > { %p1895_p9 = pnand %p3107_p7, %p3106_p5 }
 0x12d   : > { %2049 = dma.done.wait (!%p1895_p9), %s1774_s5, 32768  }
 0x12e   : > { %2051 = vsyncadd (!%p1895_p9), %s1774_s5, 4294934528  ;;  %p18_p11 = scmp.ge.s32.totalorder %s2115_s15, 4   ;;  %s3108_s9 = smov %s2058_s10 }
 0x12f   : > { %s3109_s10 = smov %s2062_s11  ;;  %s3110_s11 = smov %s2127_s18 }
 0x130   : > { %s3111_s12 = smov %s2115_s15  ;;  %20 = sbr.rel (!%p18_p11) target bundleno = 7 (0x7), region = 86 }
 0x137   :  { %1779 = vsyncpa [#allocation3], 1 }
 0x138   :  { %1781 = vsyncpa [#allocation3 + $0x1], 1 }
 0x139   :  { %1782 = vsyncpa [#allocation6], 1 }
 0x13a   :  { %1784 = vsyncpa [#allocation6 + $0x1], 1 }
 0x13b   :  { %1785 = vsyncpa [#allocation4], 1 }
 0x13c   :  { %1787 = vsyncpa [#allocation4 + $0x1], 1 }

</bundles_post_ra>
